<compile_context>
chip_gen: v6e
topology: v6e:2x2x1
jax: 0.10.0
libtpu: 0.0.40
codegen_flags: <defaults>
</compile_context>

<pallas_src>
import functools

import jax
import jax.numpy as jnp
from jax.experimental import pallas as pl
from jax.experimental.pallas import tpu as pltpu

NEG_INF = -1e30  # logit fill for padded class columns (exp underflows to 0)


def _round_up(v, m):
    return ((v + m - 1) // m) * m


def _make_kernel(n_in_p, h_lane):
    """Kernel over one (tb, n_in_p) batch tile; weights/biases VMEM-resident."""

    def kernel(x_ref, w12_ref, b12_ref, w3_ref, b3_ref, o_ref):
        x = x_ref[...].astype(jnp.bfloat16)            # f32 -> bf16 cast on VPU

        # Layer 1: Linear + ReLU. Row slices are (16,128)-tile aligned
        # because n_in_p is a multiple of 16.
        w1 = w12_ref[0:n_in_p, :]                      # (n_in_p, h_lane) bf16
        b1 = b12_ref[0:1, :]                           # (1, h_lane) f32
        h1 = jnp.dot(x, w1, preferred_element_type=jnp.float32) + b1
        h1 = jnp.maximum(h1, 0.0)

        # Dropout(p=0.1) is identity at inference.
        # TODO(synk): training-mode stochastic dropout not implemented (would use
        # pltpu.prng_seed + pltpu.prng_random_bits inside the kernel).

        # Layer 2: Linear + ReLU.
        w2 = w12_ref[n_in_p:n_in_p + h_lane, :]        # (h_lane, h_lane) bf16
        b2 = b12_ref[1:2, :]
        h2 = jnp.dot(h1.astype(jnp.bfloat16), w2,
                     preferred_element_type=jnp.float32) + b2
        h2 = jnp.maximum(h2, 0.0)

        # Output layer: Linear + Softmax over the lane-dense padded class slab.
        # Padded columns carry a NEG_INF bias -> exp == 0, so the softmax over
        # the first C columns matches the unpadded softmax exactly.
        logits = jnp.dot(h2.astype(jnp.bfloat16), w3_ref[...],
                         preferred_element_type=jnp.float32) + b3_ref[...]
        m = jnp.max(logits, axis=-1, keepdims=True)
        e = jnp.exp(logits - m)
        denom = jnp.sum(e, axis=-1, keepdims=True)
        probs = e * pl.reciprocal(denom, approx=True)  # EUP vrcp (idle slot)
        o_ref[...] = probs.astype(o_ref.dtype)         # bf16 lane-dense writeback

    return kernel


def pack_params(params):
    """Pack raw (w1,b1,w2,b2,w3,b3) into VMEM-resident slabs.

    Call ONCE at load time (outside the jitted forward) and pass the result to
    basicnet_forward -- per-call packing was pure overhead."""
    w1, b1, w2, b2, w3, b3 = params
    n_in, H = w1.shape
    C = w3.shape[1]

    n_in_p = _round_up(n_in, 16)        # bf16 sublane quantum -> aligned row slices
    h_lane = _round_up(H, 128)          # lane-dense hidden width (also rows of w2/w3)
    c_pad = _round_up(max(C, 1), 128)   # lane-dense output slab width

    def pad2(a, rows, cols, fill=0.0):
        return jnp.pad(a, ((0, rows - a.shape[0]), (0, cols - a.shape[1])),
                       constant_values=fill)

    # Hidden-width slab: [w1 ; w2], each segment padded to the 16-row quantum.
    w12 = jnp.concatenate(
        [pad2(w1, n_in_p, h_lane), pad2(w2, h_lane, h_lane)], axis=0
    ).astype(jnp.bfloat16)
    b12 = jnp.concatenate(
        [pad2(b1, 1, h_lane), pad2(b2, 1, h_lane)], axis=0
    ).astype(jnp.float32)

    # Output-layer slab kept at its own lane width (c_pad), not max(H, c_pad).
    w3p = pad2(w3, h_lane, c_pad).astype(jnp.bfloat16)
    b3p = pad2(b3, 1, c_pad, fill=NEG_INF).astype(jnp.float32)

    packed = (w12, b12, w3p, b3p)
    meta = dict(n_in=n_in, n_hidden=H, n_classes=C)
    return packed, meta


def _pick_batch_tile(B, cap):
    """Largest multiple-of-8 tile <= cap that still gives >= 2 grid steps
    (keeps both TensorCores busy on v7x; harmless on single-TC chips)."""
    b8 = _round_up(B, 8)
    half = _round_up((b8 + 1) // 2, 8)
    tb = min(max(cap, 8), half)
    return max((tb // 8) * 8, 8)        # clamp to a multiple of 8


@functools.partial(jax.jit, static_argnames=("n_classes", "tile_b"))
def basicnet_forward(x, packed, *, n_classes, tile_b=1024):
    w12, b12, w3p, b3p = packed
    B, n_in = x.shape
    n_in_p = _round_up(n_in, 16)
    h_lane = w12.shape[1]
    c_pad = w3p.shape[1]
    assert w12.shape[0] == n_in_p + h_lane, "packed params don't match x feature dim"

    tb = _pick_batch_tile(B, tile_b)
    b_pad = _round_up(B, tb)

    # Keep x in f32 (kernel casts to bf16); only materialise a pad when needed.
    if b_pad != B or n_in_p != n_in:
        x = jnp.pad(x, ((0, b_pad - B), (0, n_in_p - n_in)))

    # VMEM budget: double-buffered x/out tiles + resident slabs + f32 intermediates.
    est = 2 * (tb * n_in_p * 4 + tb * c_pad * 2)
    est += 2 * (w12.size * 2 + w3p.size * 2 + (b12.size + b3p.size) * 4)
    est += 5 * tb * max(h_lane, c_pad) * 4
    vmem_limit = min(48 << 20, max(32 << 20, int(est * 3 // 2)))

    kernel = _make_kernel(n_in_p, h_lane)
    out = pl.pallas_call(
        kernel,
        out_shape=jax.ShapeDtypeStruct((b_pad, c_pad), jnp.bfloat16),
        grid=(b_pad // tb,),
        in_specs=[
            pl.BlockSpec((tb, n_in_p), lambda i: (i, 0)),  # batch-tiled input (f32)
            pl.BlockSpec(w12.shape, lambda i: (0, 0)),     # VMEM-resident w1|w2
            pl.BlockSpec(b12.shape, lambda i: (0, 0)),     # VMEM-resident b1|b2
            pl.BlockSpec(w3p.shape, lambda i: (0, 0)),     # VMEM-resident w3
            pl.BlockSpec(b3p.shape, lambda i: (0, 0)),     # VMEM-resident b3
        ],
        out_specs=pl.BlockSpec((tb, c_pad), lambda i: (i, 0)),
        compiler_params=pltpu.CompilerParams(
            dimension_semantics=("parallel",),   # shard batch tiles across TCs (v7x)
            vmem_limit_bytes=vmem_limit,
        ),
    )(x, w12, b12, w3p, b3p)
    return out[:B, :n_classes].astype(jnp.float32)


def init_params(key, n_unit_in, n_units_hidden, categories_cnt):
    """Deterministic synthetic init; weights stored as (in, out) == PyTorch W^T."""
    ks = jax.random.split(key, 6)
    s1 = 1.0 / jnp.sqrt(n_unit_in)
    s2 = 1.0 / jnp.sqrt(n_units_hidden)
    w1 = jax.random.uniform(ks[0], (n_unit_in, n_units_hidden), jnp.float32, -s1, s1)
    b1 = jax.random.uniform(ks[1], (1, n_units_hidden), jnp.float32, -s1, s1)
    w2 = jax.random.uniform(ks[2], (n_units_hidden, n_units_hidden), jnp.float32, -s2, s2)
    b2 = jax.random.uniform(ks[3], (1, n_units_hidden), jnp.float32, -s2, s2)
    w3 = jax.random.uniform(ks[4], (n_units_hidden, categories_cnt), jnp.float32, -s2, s2)
    b3 = jax.random.uniform(ks[5], (1, categories_cnt), jnp.float32, -s2, s2)
    return (w1, b1, w2, b2, w3, b3)


def reference_forward(x, params, emulate_bf16=False):
    """Pure-JAX reference. emulate_bf16=True applies the same operand rounding
    the kernel uses (bf16 matmul inputs, f32 accumulation/epilogue)."""
    w1, b1, w2, b2, w3, b3 = params
    if emulate_bf16:
        cast = lambda a: a.astype(jnp.bfloat16).astype(jnp.float32)
    else:
        cast = lambda a: a
    h1 = jnp.maximum(jnp.dot(cast(x), cast(w1), preferred_element_type=jnp.float32) + b1, 0.0)
    h2 = jnp.maximum(jnp.dot(cast(h1), cast(w2), preferred_element_type=jnp.float32) + b2, 0.0)
    logits = jnp.dot(cast(h2), cast(w3), preferred_element_type=jnp.float32) + b3
    return jax.nn.softmax(logits, axis=-1)


if __name__ == "__main__":
    key = jax.random.PRNGKey(0)
    k_x, k_p = jax.random.split(key)

    batch = 1024           # -> tb=512, two grid steps (exercises batch tiling / megacore)
    n_unit_in = 32
    n_units_hidden = 100   # module default; exercises lane/row padding to 128
    categories_cnt = 4

    x = jax.random.normal(k_x, (batch, n_unit_in), dtype=jnp.float32)
    params = init_params(k_p, n_unit_in, n_units_hidden, categories_cnt)
    packed, meta = pack_params(params)          # packed once, outside the jit

    out = jax.block_until_ready(
        basicnet_forward(x, packed, n_classes=meta["n_classes"]))

    ref_bf16 = reference_forward(x, params, emulate_bf16=True)
    ref_f32 = reference_forward(x, params, emulate_bf16=False)

    assert out.shape == (batch, categories_cnt)
    # bf16 output + approx reciprocal -> tolerances relaxed vs the previous f32 path.
    assert jnp.allclose(out, ref_bf16, atol=6e-3), "mismatch vs bf16-emulating reference"
    assert jnp.allclose(out, ref_f32, atol=3e-2), "mismatch vs f32 reference"
    assert jnp.allclose(jnp.sum(out, axis=-1), 1.0, atol=2e-2), "softmax rows must sum to ~1"

    print("KERNEL_OK")
</pallas_src>

<mosaic_0001>
module attributes {stable_mosaic.version = 11 : i64} {
  func.func @kernel(%arg0: i32, %arg1: memref<512x32xf32, #tpu.memory_space<vmem>>, %arg2: memref<160x128xbf16, #tpu.memory_space<vmem>>, %arg3: memref<2x128xf32, #tpu.memory_space<vmem>>, %arg4: memref<128x128xbf16, #tpu.memory_space<vmem>>, %arg5: memref<1x128xf32, #tpu.memory_space<vmem>>, %arg6: memref<512x128xbf16, #tpu.memory_space<vmem>>) attributes {dimension_semantics = [#tpu.dimension_semantics<parallel>], iteration_bounds = array<i64: 2>, scalar_prefetch = 0 : i64, scratch_operands = 0 : i64, tpu.core_type = #tpu.core_type<tc>, window_params = [{transform_indices = @transform_0, window_bounds = array<i64: 512, 32>}, {pipeline_mode = #tpu.pipeline_mode<synchronous>, transform_indices = @transform_1, window_bounds = array<i64: 160, 128>}, {pipeline_mode = #tpu.pipeline_mode<synchronous>, transform_indices = @transform_2, window_bounds = array<i64: 2, 128>}, {pipeline_mode = #tpu.pipeline_mode<synchronous>, transform_indices = @transform_3, window_bounds = array<i64: 128, 128>}, {pipeline_mode = #tpu.pipeline_mode<synchronous>, transform_indices = @transform_4, window_bounds = array<i64: 1, 128>}, {transform_indices = @transform_5, window_bounds = array<i64: 512, 128>}]} {
    %c0 = arith.constant 0 : index
    %c0_0 = arith.constant 0 : index
    %0 = vector.load %arg1[%c0, %c0_0] : memref<512x32xf32, #tpu.memory_space<vmem>>, vector<512x32xf32>
    %1 = arith.truncf %0 : vector<512x32xf32> to vector<512x32xbf16>
    %c0_1 = arith.constant 0 : index
    %c0_2 = arith.constant 0 : index
    %2 = vector.load %arg2[%c0_1, %c0_2] : memref<160x128xbf16, #tpu.memory_space<vmem>>, vector<32x128xbf16>
    %c0_3 = arith.constant 0 : index
    %c0_4 = arith.constant 0 : index
    %3 = vector.load %arg3[%c0_3, %c0_4] : memref<2x128xf32, #tpu.memory_space<vmem>>, vector<1x128xf32>
    %cst = arith.constant dense<0.000000e+00> : vector<512x128xf32>
    %4 = tpu.matmul %1, %2, %cst {dimension_numbers = #tpu.dot_dimension_numbers<[1], [0], [0], [1], [0, 0, 1, 1], [], []>} : vector<512x32xbf16>, vector<32x128xbf16>, vector<512x128xf32> -> vector<512x128xf32>
    %5 = vector.broadcast %3 : vector<1x128xf32> to vector<512x128xf32>
    %6 = arith.addf %4, %5 : vector<512x128xf32>
    %cst_5 = arith.constant 0.000000e+00 : f32
    %7 = vector.broadcast %cst_5 : f32 to vector<512x128xf32>
    %8 = arith.maximumf %6, %7 : vector<512x128xf32>
    %c32 = arith.constant 32 : index
    %c0_6 = arith.constant 0 : index
    %9 = vector.load %arg2[%c32, %c0_6] : memref<160x128xbf16, #tpu.memory_space<vmem>>, vector<128x128xbf16>
    %c1 = arith.constant 1 : index
    %c0_7 = arith.constant 0 : index
    %10 = vector.load %arg3[%c1, %c0_7] : memref<2x128xf32, #tpu.memory_space<vmem>>, vector<1x128xf32>
    %11 = arith.truncf %8 : vector<512x128xf32> to vector<512x128xbf16>
    %cst_8 = arith.constant dense<0.000000e+00> : vector<512x128xf32>
    %12 = tpu.matmul %11, %9, %cst_8 {dimension_numbers = #tpu.dot_dimension_numbers<[1], [0], [0], [1], [0, 0, 1, 1], [], []>} : vector<512x128xbf16>, vector<128x128xbf16>, vector<512x128xf32> -> vector<512x128xf32>
    %13 = vector.broadcast %10 : vector<1x128xf32> to vector<512x128xf32>
    %14 = arith.addf %12, %13 : vector<512x128xf32>
    %cst_9 = arith.constant 0.000000e+00 : f32
    %15 = vector.broadcast %cst_9 : f32 to vector<512x128xf32>
    %16 = arith.maximumf %14, %15 : vector<512x128xf32>
    %17 = arith.truncf %16 : vector<512x128xf32> to vector<512x128xbf16>
    %c0_10 = arith.constant 0 : index
    %c0_11 = arith.constant 0 : index
    %18 = vector.load %arg4[%c0_10, %c0_11] : memref<128x128xbf16, #tpu.memory_space<vmem>>, vector<128x128xbf16>
    %cst_12 = arith.constant dense<0.000000e+00> : vector<512x128xf32>
    %19 = tpu.matmul %17, %18, %cst_12 {dimension_numbers = #tpu.dot_dimension_numbers<[1], [0], [0], [1], [0, 0, 1, 1], [], []>} : vector<512x128xbf16>, vector<128x128xbf16>, vector<512x128xf32> -> vector<512x128xf32>
    %c0_13 = arith.constant 0 : index
    %c0_14 = arith.constant 0 : index
    %20 = vector.load %arg5[%c0_13, %c0_14] : memref<1x128xf32, #tpu.memory_space<vmem>>, vector<1x128xf32>
    %21 = vector.broadcast %20 : vector<1x128xf32> to vector<512x128xf32>
    %22 = arith.addf %19, %21 : vector<512x128xf32>
    %cst_15 = arith.constant dense<0xFF800000> : vector<512xf32>
    %23 = vector.multi_reduction <maximumf>, %22, %cst_15 [1] : vector<512x128xf32> to vector<512xf32>
    %24 = vector.shape_cast %23 : vector<512xf32> to vector<512x1xf32>
    %25 = vector.broadcast %24 : vector<512x1xf32> to vector<512x128xf32>
    %26 = arith.subf %22, %25 : vector<512x128xf32>
    %27 = math.exp %26 : vector<512x128xf32>
    %cst_16 = arith.constant dense<0.000000e+00> : vector<512xf32>
    %28 = vector.multi_reduction <add>, %27, %cst_16 [1] : vector<512x128xf32> to vector<512xf32>
    %29 = vector.shape_cast %28 : vector<512xf32> to vector<512x1xf32>
    %30 = tpu.reciprocal %29 {approx = true} : vector<512x1xf32> -> vector<512x1xf32>
    %31 = vector.broadcast %30 : vector<512x1xf32> to vector<512x128xf32>
    %32 = arith.mulf %27, %31 : vector<512x128xf32>
    %33 = arith.truncf %32 : vector<512x128xf32> to vector<512x128xbf16>
    %c0_17 = arith.constant 0 : index
    %c0_18 = arith.constant 0 : index
    %34 = vector.load %arg6[%c0_17, %c0_18] : memref<512x128xbf16, #tpu.memory_space<vmem>>, vector<512x128xbf16>
    tpu.vector_store %arg6[%c0_17, %c0_18], %33 {strides = array<i32>} : memref<512x128xbf16, #tpu.memory_space<vmem>>, vector<512x128xbf16>,
    return
  }
  func.func @transform_0(%arg0: i32) -> (i32, i32) {
    %c0_i32 = arith.constant 0 : i32
    %c0_i32_0 = arith.constant 0 : i32
    return %arg0, %c0_i32 : i32, i32
  }
  func.func @transform_1(%arg0: i32) -> (i32, i32) {
    %c0_i32 = arith.constant 0 : i32
    %c0_i32_0 = arith.constant 0 : i32
    %c0_i32_1 = arith.constant 0 : i32
    return %c0_i32, %c0_i32_0 : i32, i32
  }
  func.func @transform_2(%arg0: i32) -> (i32, i32) {
    %c0_i32 = arith.constant 0 : i32
    %c0_i32_0 = arith.constant 0 : i32
    %c0_i32_1 = arith.constant 0 : i32
    return %c0_i32, %c0_i32_0 : i32, i32
  }
  func.func @transform_3(%arg0: i32) -> (i32, i32) {
    %c0_i32 = arith.constant 0 : i32
    %c0_i32_0 = arith.constant 0 : i32
    %c0_i32_1 = arith.constant 0 : i32
    return %c0_i32, %c0_i32_0 : i32, i32
  }
  func.func @transform_4(%arg0: i32) -> (i32, i32) {
    %c0_i32 = arith.constant 0 : i32
    %c0_i32_0 = arith.constant 0 : i32
    %c0_i32_1 = arith.constant 0 : i32
    return %c0_i32, %c0_i32_0 : i32, i32
  }
  func.func @transform_5(%arg0: i32) -> (i32, i32) {
    %c0_i32 = arith.constant 0 : i32
    %c0_i32_0 = arith.constant 0 : i32
    return %arg0, %c0_i32 : i32, i32
  }
}

</mosaic_0001>

<bundles_post_ra>
// kernel: basicnet_forward.1
= control target key start
LH: loop header
LB: loop body
LE: loop exit
PB: predicated region body
PF: predicated region fallthrough
CT: control target
= control target key end

     0   :  { %s3643_s18 = smov 0   ;;  %s4629_s0 = inlined_call_operand.vmem [shape: f32[1024,32], index: 0, kind: input, shape index: {}]   ;;  %s4630_s1 = inlined_call_operand.vmem [shape: bf16[160,128], index: 1, kind: input, shape index: {}]   ;;  %s4631_s2 = inlined_call_operand.vmem [shape: f32[2,128], index: 2, kind: input, shape index: {}]   ;;  %s4632_s3 = inlined_call_operand.vmem [shape: bf16[128,128], index: 3, kind: input, shape index: {}]   ;;  %s4633_s4 = inlined_call_operand.vmem [shape: f32[1,128], index: 4, kind: input, shape index: {}]   ;;  %s4634_s5 = inlined_call_operand.vmem [shape: bf16[1024,128], index: 5, kind: output, shape index: {}]  }
   0x1 LB: > { %s2594_s19 = sadd.s32 4294967295, %s3611_s18   ;;  %p2598_p0 = scmp.ge.s32.totalorder %s3611_s18, 1  ;;  %s3611_s18 = sphi %s3643_s18, %s15_s18  }
   0x2   : > { %p188_p1 = scmp.lt.s32.totalorder %s3611_s18, 3 }
   0x4   : > { %p189_p2 = pnand %p2598_p0, %p188_p1 }
   0x6   : > { %192 = sbr.rel (%p189_p2) target bundleno = 1073 (0x431), region = 40 }
   0xb   : > { %v3331_v0 = vld [vmem:[%s4630_s1 + $0x8] sm:$0xff]   ;;  %s2599_s22 = sshll.u32 %s2594_s19, 6  ;;  %v3332_v1 = vld [vmem:[%s4630_s1] sm:$0xff]   ;;  %vm346_vm0 = vcmask 261120   ;;  %v3335_v38 = vld [vmem:[%s4630_s1 + $0x38] sm:$0xff]  }
   0xc   : > { %p217_p3 = scmp.lt.s32.totalorder %s2599_s22, 127  ;;  %3091 = vmatprep.subr.bf16.mxu0 %v3331_v0  ;;  %3319 = vmatprep.subr.bf16.mxu1 %v3331_v0  ;;  %v3333_v2 = vld [vmem:[%s4630_s1 + $0x48] sm:$0xff]   ;;  %v3334_v29 = vld [vmem:[%s4630_s1 + $0x40] sm:$0xff]   ;;  %v3336_v40 = vld [vmem:[%s4630_s1 + $0x30] sm:$0xff]  }
   0xd   : > { %3092 = vmatpush3.bf16.msra.mxu0 %v3331_v0  ;;  %3321 = vmatpush3.bf16.msra.mxu1 %v3331_v0  ;;  %v3337_v50 = vld [vmem:[%s4630_s1 + $0x28] sm:$0xff]   ;;  %v3338_v57 = vld [vmem:[%s4630_s1 + $0x20] sm:$0xff]  }
   0xe   : > { %s4717_s22 = smov (!%p217_p3, %s2599_s22), 127  ;;  %3093 = vmatprep.subr.bf16.mxu0 %v3332_v1  ;;  %3320 = vmatprep.subr.bf16.mxu1 %v3332_v1 }
   0xf   : > { %s2600_s27 = sshll.u32 %s4717_s22, 3  ;;  %s2602_s20 = sshll.u32 %s4717_s22, 2 }
  0x10   : > { %s3666_s30 = scalar_lea.vmem %s4629_s0, %s2600_s27  ;;  %s4530_s24 = scalar_lea.vmem %s4634_s5, %s2602_s20 }
  0x11   : > { %3094 = vmatpush3.bf16.msra.mxu0 %v3332_v1  ;;  %v229_v3 = vld [vmem:[%s3666_s30] sm:$0xff]  ;;  %v230_v4 = vld [vmem:[%s3666_s30 + $0x8] sm:$0xff]  ;;  %v231_v5 = vld [vmem:[%s3666_s30 + $0x10] sm:$0xff]  ;;  %3322 = vmatpush3.bf16.msra.mxu1 %v3332_v1 }
  0x12   : > { %v293_v6 = vpack.c.bf16 %v230_v4, %v229_v3  ;;  %v232_v7 = vld [vmem:[%s3666_s30 + $0x18] sm:$0xff]  ;;  %v233_v8 = vld [vmem:[%s3666_s30 + $0x20] sm:$0xff]  ;;  %v234_v9 = vld [vmem:[%s3666_s30 + $0x28] sm:$0xff]  ;;  %3159 = vmatprep.subr.bf16.mxu1 %v3333_v2 }
  0x13   : > { %v294_v10 = vpack.c.bf16 %v232_v7, %v231_v5  ;;  %v295_v11 = vpack.c.bf16 %v234_v9, %v233_v8  ;;  %v235_v12 = vld [vmem:[%s3666_s30 + $0x30] sm:$0xff]  ;;  %v236_v13 = vld [vmem:[%s3666_s30 + $0x38] sm:$0xff]  ;;  %v237_v14 = vld [vmem:[%s3666_s30 + $0x40] sm:$0xff] }
  0x14   : > { %3095 = vmatprep.mubr.msk.bf16.mxu0 %vm346_vm0, %v293_v6  ;;  %v238_v15 = vld [vmem:[%s3666_s30 + $0x48] sm:$0xff]  ;;  %v296_v16 = vpack.c.bf16 %v236_v13, %v235_v12  ;;  %v261_v18 = vld [vmem:[%s3666_s30 + $0x100] sm:$0xff]  ;;  %v263_v20 = vld [vmem:[%s3666_s30 + $0x110] sm:$0xff] }
  0x15   : > { %3096 = vmatmul.mubr.msk.bf16.vlgmr.msra.gmra.mxu0 %vm346_vm0, %v294_v10  ;;  %v297_v17 = vpack.c.bf16 %v238_v15, %v237_v14  ;;  %v262_v19 = vld [vmem:[%s3666_s30 + $0x108] sm:$0xff]  ;;  %v264_v21 = vld [vmem:[%s3666_s30 + $0x118] sm:$0xff]  ;;  %v265_v24 = vld [vmem:[%s3666_s30 + $0x120] sm:$0xff] }
  0x16   : > { %3099 = vmatprep.mubr.msk.bf16.mxu0 %vm346_vm0, %v295_v11  ;;  %v309_v22 = vpack.c.bf16 %v262_v19, %v261_v18  ;;  %v310_v23 = vpack.c.bf16 %v264_v21, %v263_v20  ;;  %v266_v25 = vld [vmem:[%s3666_s30 + $0x128] sm:$0xff]  ;;  %v239_v26 = vld [vmem:[%s3666_s30 + $0x50] sm:$0xff]  ;;  %v240_v27 = vld [vmem:[%s3666_s30 + $0x58] sm:$0xff] }
  0x17   : > { %v311_v28 = vpack.c.bf16 %v266_v25, %v265_v24  ;;  %v241_v30 = vld [vmem:[%s3666_s30 + $0x60] sm:$0xff]  ;;  %v242_v31 = vld [vmem:[%s3666_s30 + $0x68] sm:$0xff]  ;;  %v298_v32 = vpack.c.bf16 %v240_v27, %v239_v26  ;;  %v267_v33 = vld [vmem:[%s3666_s30 + $0x130] sm:$0xff] }
  0x18   : > { %3127 = vmatprep.mubr.msk.bf16.mxu1 %vm346_vm0, %v309_v22  ;;  %v268_v34 = vld [vmem:[%s3666_s30 + $0x138] sm:$0xff]  ;;  %v299_v35 = vpack.c.bf16 %v242_v31, %v241_v30  ;;  %v269_v36 = vld [vmem:[%s3666_s30 + $0x140] sm:$0xff]  ;;  %v270_v37 = vld [vmem:[%s3666_s30 + $0x148] sm:$0xff] }
  0x19   : > { %3128 = vmatmul.mubr.msk.bf16.vlgmr.msra.gmra.mxu1 %vm346_vm0, %v310_v23  ;;  %v312_v39 = vpack.c.bf16 %v268_v34, %v267_v33  ;;  %v243_v41 = vld [vmem:[%s3666_s30 + $0x70] sm:$0xff]  ;;  %v244_v42 = vld [vmem:[%s3666_s30 + $0x78] sm:$0xff]  ;;  %v245_v43 = vld [vmem:[%s3666_s30 + $0x80] sm:$0xff]  ;;  %v313_v44 = vpack.c.bf16 %v270_v37, %v269_v36 }
  0x1a   : > { %3131 = vmatprep.mubr.msk.bf16.mxu1 %vm346_vm0, %v311_v28  ;;  %3160 = vmatpush3.bf16.msra.mxu1 %v3333_v2  ;;  %v246_v45 = vld [vmem:[%s3666_s30 + $0x88] sm:$0xff]  ;;  %v271_v46 = vld [vmem:[%s3666_s30 + $0x150] sm:$0xff]  ;;  %v272_v47 = vld [vmem:[%s3666_s30 + $0x158] sm:$0xff]  ;;  %v300_v51 = vpack.c.bf16 %v244_v42, %v243_v41 }
  0x1b   : > { %3161 = vmatprep.subr.bf16.mxu1 %v3334_v29  ;;  %v273_v48 = vld [vmem:[%s3666_s30 + $0x160] sm:$0xff]  ;;  %v274_v49 = vld [vmem:[%s3666_s30 + $0x168] sm:$0xff]  ;;  %v301_v52 = vpack.c.bf16 %v246_v45, %v245_v43  ;;  %v247_v53 = vld [vmem:[%s3666_s30 + $0x90] sm:$0xff]  ;;  %v314_v54 = vpack.c.bf16 %v272_v47, %v271_v46 }
  0x1c   : > { %v315_v55 = vpack.c.bf16 %v274_v49, %v273_v48  ;;  %v248_v56 = vld [vmem:[%s3666_s30 + $0x98] sm:$0xff]  ;;  %v249_v58 = vld [vmem:[%s3666_s30 + $0xa0] sm:$0xff]  ;;  %v250_v59 = vld [vmem:[%s3666_s30 + $0xa8] sm:$0xff] }
  0x1d   : > { %3100 = vmatmul.mubr.msk.bf16.gmra.mxu0 %vm346_vm0, %v296_v16  ;;  %v302_v60 = vpack.c.bf16 %v248_v56, %v247_v53  ;;  %v275_v61 = vld [vmem:[%s3666_s30 + $0x170] sm:$0xff]  ;;  %v276_v62 = vld [vmem:[%s3666_s30 + $0x178] sm:$0xff]  ;;  %v303_v63 = vpack.c.bf16 %v250_v59, %v249_v58  ;;  %v277_v0 = vld [vmem:[%s3666_s30 + $0x180] sm:$0xff] }
  0x1e   : > { %3103 = vmatprep.mubr.msk.bf16.mxu0 %vm346_vm0, %v297_v17  ;;  %3162 = vmatpush3.bf16.msra.mxu1 %v3334_v29  ;;  %v278_v1 = vld [vmem:[%s3666_s30 + $0x188] sm:$0xff]  ;;  %v3339_v2 = vld [vmem:[%s4630_s1 + $0x18] sm:$0xff]   ;;  %v316_v3 = vpack.c.bf16 %v276_v62, %v275_v61  ;;  %v251_v5 = vld [vmem:[%s3666_s30 + $0xb0] sm:$0xff] }
  0x1f   : > { %3163 = vmatprep.subr.bf16.mxu1 %v3335_v38  ;;  %v317_v4 = vpack.c.bf16 %v278_v1, %v277_v0  ;;  %v252_v6 = vld [vmem:[%s3666_s30 + $0xb8] sm:$0xff]  ;;  %v253_v7 = vld [vmem:[%s3666_s30 + $0xc0] sm:$0xff]  ;;  %v254_v8 = vld [vmem:[%s3666_s30 + $0xc8] sm:$0xff] }
  0x20   : > { %v304_v9 = vpack.c.bf16 %v252_v6, %v251_v5  ;;  %v279_v10 = vld [vmem:[%s3666_s30 + $0x190] sm:$0xff]  ;;  %v280_v11 = vld [vmem:[%s3666_s30 + $0x198] sm:$0xff]  ;;  %v305_v12 = vpack.c.bf16 %v254_v8, %v253_v7  ;;  %v281_v13 = vld [vmem:[%s3666_s30 + $0x1a0] sm:$0xff] }
  0x21   : > { %3132 = vmatmul.mubr.msk.bf16.gmra.mxu1 %vm346_vm0, %v312_v39  ;;  %v282_v14 = vld [vmem:[%s3666_s30 + $0x1a8] sm:$0xff]  ;;  %v318_v15 = vpack.c.bf16 %v280_v11, %v279_v10  ;;  %v255_v17 = vld [vmem:[%s3666_s30 + $0xd0] sm:$0xff]  ;;  %v256_v18 = vld [vmem:[%s3666_s30 + $0xd8] sm:$0xff] }
  0x22   : > { %3135 = vmatprep.mubr.msk.bf16.mxu1 %vm346_vm0, %v313_v44  ;;  %3164 = vmatpush3.bf16.msra.mxu1 %v3335_v38  ;;  %v319_v16 = vpack.c.bf16 %v282_v14, %v281_v13  ;;  %v257_v19 = vld [vmem:[%s3666_s30 + $0xe0] sm:$0xff]  ;;  %v258_v20 = vld [vmem:[%s3666_s30 + $0xe8] sm:$0xff]  ;;  %v306_v21 = vpack.c.bf16 %v256_v18, %v255_v17  ;;  %v283_v22 = vld [vmem:[%s3666_s30 + $0x1b0] sm:$0xff] }
  0x23   : > { %3165 = vmatprep.subr.bf16.mxu1 %v3336_v40  ;;  %v284_v23 = vld [vmem:[%s3666_s30 + $0x1b8] sm:$0xff]  ;;  %v307_v24 = vpack.c.bf16 %v258_v20, %v257_v19  ;;  %v285_v25 = vld [vmem:[%s3666_s30 + $0x1c0] sm:$0xff]  ;;  %v286_v26 = vld [vmem:[%s3666_s30 + $0x1c8] sm:$0xff] }
  0x24   : > { %v320_v27 = vpack.c.bf16 %v284_v23, %v283_v22  ;;  %v321_v28 = vpack.c.bf16 %v286_v26, %v285_v25  ;;  %v259_v29 = vld [vmem:[%s3666_s30 + $0xf0] sm:$0xff]  ;;  %v260_v30 = vld [vmem:[%s3666_s30 + $0xf8] sm:$0xff]  ;;  %v289_v34 = vld [vmem:[%s3666_s30 + $0x1e0] sm:$0xff] }
  0x25   : > { %3104 = vmatmul.mubr.msk.bf16.gmra.mxu0 %vm346_vm0, %v298_v32  ;;  %v308_v31 = vpack.c.bf16 %v260_v30, %v259_v29  ;;  %v287_v32 = vld [vmem:[%s3666_s30 + $0x1d0] sm:$0xff]  ;;  %v288_v33 = vld [vmem:[%s3666_s30 + $0x1d8] sm:$0xff]  ;;  %v3788_v44 = vld [vmem:[%s4631_s2] ss:$0 sm:$0xff] }
  0x26   : > { %3107 = vmatprep.mubr.msk.bf16.mxu0 %vm346_vm0, %v299_v35  ;;  %3166 = vmatpush3.bf16.msra.mxu1 %v3336_v40  ;;  %v290_v35 = vld [vmem:[%s3666_s30 + $0x1e8] sm:$0xff]  ;;  %v322_v36 = vpack.c.bf16 %v288_v33, %v287_v32  ;;  %v291_v38 = vld [vmem:[%s3666_s30 + $0x1f0] sm:$0xff]  ;;  %v292_v39 = vld [vmem:[%s3666_s30 + $0x1f8] sm:$0xff] }
  0x27   : > { %3167 = vmatprep.subr.bf16.mxu1 %v3337_v50  ;;  %v323_v37 = vpack.c.bf16 %v290_v35, %v289_v34  ;;  %v324_v40 = vpack.c.bf16 %v292_v39, %v291_v38  ;;  %v3340_v41 = vld [vmem:[%s4630_s1 + $0x10] sm:$0xff]   ;;  %v3343_v59 = vld [vmem:[%s4632_s3 + $0x28] sm:$0xff]   ;;  %v3344_v5 = vld [vmem:[%s4632_s3 + $0x20] sm:$0xff]  }
  0x28   : > { %v3346_v25 = vld [vmem:[%s4632_s3 + $0x10] sm:$0xff]   ;;  %v3347_v35 = vld [vmem:[%s4632_s3 + $0x8] sm:$0xff]  }
  0x29   : > { %3136 = vmatmul.mubr.msk.bf16.gmra.mxu1 %vm346_vm0, %v314_v54 }
  0x2a   : > { %3139 = vmatprep.mubr.msk.bf16.mxu1 %vm346_vm0, %v315_v55  ;;  %3168 = vmatpush3.bf16.msra.mxu1 %v3337_v50  ;;  %v3341_v50 = vld [vmem:[%s4632_s3 + $0x38] sm:$0xff]  }
  0x2b   : > { %3169 = vmatprep.subr.bf16.mxu1 %v3338_v57  ;;  %3239 = vmatprep.subr.bf16.mxu0 %v3341_v50 }
  0x2c   : > { %3240 = vmatpush3.bf16.msra.mxu0 %v3341_v50 }
  0x2d   : > { %3108 = vmatmul.mubr.msk.bf16.gmra.mxu0 %vm346_vm0, %v300_v51  ;;  %v3342_v51 = vld [vmem:[%s4632_s3 + $0x30] sm:$0xff]  }
  0x2e   : > { %3111 = vmatprep.mubr.msk.bf16.mxu0 %vm346_vm0, %v301_v52  ;;  %3170 = vmatpush3.bf16.msra.mxu1 %v3338_v57 }
  0x2f   : > { %3171 = vmatprep.subr.bf16.mxu1 %v3339_v2  ;;  %3241 = vmatprep.subr.bf16.mxu0 %v3342_v51 }
  0x30   : > { %3242 = vmatpush3.bf16.msra.mxu0 %v3342_v51 }
  0x31   : > { %3140 = vmatmul.mubr.msk.bf16.gmra.mxu1 %vm346_vm0, %v316_v3  ;;  %3243 = vmatprep.subr.bf16.mxu0 %v3343_v59 }
  0x32   : > { %3143 = vmatprep.mubr.msk.bf16.mxu1 %vm346_vm0, %v317_v4  ;;  %3172 = vmatpush3.bf16.msra.mxu1 %v3339_v2 }
  0x33   : > { %3173 = vmatprep.subr.bf16.mxu1 %v3340_v41 }
  0x34   : > { %3244 = vmatpush3.bf16.msra.mxu0 %v3343_v59 }
  0x35   : > { %3112 = vmatmul.mubr.msk.bf16.gmra.mxu0 %vm346_vm0, %v302_v60  ;;  %3245 = vmatprep.subr.bf16.mxu0 %v3344_v5 }
  0x36   : > { %3115 = vmatprep.mubr.msk.bf16.mxu0 %vm346_vm0, %v303_v63  ;;  %3174 = vmatpush3.bf16.msra.mxu1 %v3340_v41 }
  0x38   : > { %3246 = vmatpush3.bf16.msra.mxu0 %v3344_v5 }
  0x39   : > { %3144 = vmatmul.mubr.msk.bf16.gmra.mxu1 %vm346_vm0, %v318_v15  ;;  %v3345_v15 = vld [vmem:[%s4632_s3 + $0x18] sm:$0xff]  }
  0x3a   : > { %3147 = vmatprep.mubr.msk.bf16.mxu1 %vm346_vm0, %v319_v16  ;;  %3247 = vmatprep.subr.bf16.mxu0 %v3345_v15 }
  0x3c   : > { %3248 = vmatpush3.bf16.msra.mxu0 %v3345_v15 }
  0x3d   : > { %3116 = vmatmul.mubr.msk.bf16.gmra.mxu0 %vm346_vm0, %v304_v9  ;;  %3249 = vmatprep.subr.bf16.mxu0 %v3346_v25 }
  0x3e   : > { %3119 = vmatprep.mubr.msk.bf16.mxu0 %vm346_vm0, %v305_v12 }
  0x40   : > { %3250 = vmatpush3.bf16.msra.mxu0 %v3346_v25 }
  0x41   : > { %3148 = vmatmul.mubr.msk.bf16.gmra.mxu1 %vm346_vm0, %v320_v27  ;;  %3251 = vmatprep.subr.bf16.mxu0 %v3347_v35 }
  0x42   : > { %3151 = vmatprep.mubr.msk.bf16.mxu1 %vm346_vm0, %v321_v28 }
  0x44   : > { %3252 = vmatpush3.bf16.msra.mxu0 %v3347_v35 }
  0x45   : > { %3120 = vmatmul.mubr.msk.bf16.gmra.mxu0 %vm346_vm0, %v306_v21 }
  0x46   : > { %3123 = vmatprep.mubr.msk.bf16.mxu0 %vm346_vm0, %v307_v24 }
  0x49   : > { %3152 = vmatmul.mubr.msk.bf16.gmra.mxu1 %vm346_vm0, %v322_v36 }
  0x4a   : > { %3155 = vmatprep.mubr.msk.bf16.mxu1 %vm346_vm0, %v323_v37 }
  0x4d   : > { %3124 = vmatmul.mubr.msk.bf16.gmra.mxu0 %vm346_vm0, %v308_v31 }
  0x51   : > { %3156 = vmatmul.mubr.msk.bf16.gmra.mxu1 %vm346_vm0, %v324_v40 }
  0xd5   : > { %v3097_v42 = vpop.f32.mrf.mxu0 }
  0xd6   : > { %v486_v48 = vadd.f32 %v3097_v42, %v3788_v44 }
  0xd7   : > { %v477_v43 = vpop.f32.mrf.mxu0 }
  0xd8   : > { %v478_v46 = vadd.f32 %v3788_v44, %v477_v43  ;;  %v734_v57 = vmax.f32 %v486_v48, 0.0 }
  0xd9   : > { %v3098_v45 = vpop.f32.mrf.mxu0  ;;  %v3803_v61 = vpop.f32.mrf.mxu1 }
  0xda   : > { %v489_v47 = vadd.f32 %v3098_v45, %v3788_v44  ;;  %v732_v55 = vmax.f32 %v478_v46, 0.0 }
  0xdb   : > { %v480_v49 = vpop.f32.mrf.mxu0  ;;  %v3807_v2 = vpop.f32.mrf.mxu1 }
  0xdc   : > { %v481_v52 = vadd.f32 %v3788_v44, %v480_v49  ;;  %v735_v53 = vmax.f32 %v489_v47, 0.0 }
  0xdd   : > { %v3101_v54 = vpop.f32.mrf.mxu0  ;;  %v3814_v7 = vpop.f32.mrf.mxu1 }
  0xde   : > { %v733_v56 = vmax.f32 %v481_v52, 0.0  ;;  %v814_v62 = vpack.c.bf16 %v735_v53, %v734_v57  ;;  %v502_v3 = vadd.f32 %v3101_v54, %v3788_v44 }
  0xdf   : > { %v493_v58 = vpop.f32.mrf.mxu0  ;;  %v3816_v12 = vpop.f32.mrf.mxu1 }
  0xe0   : > { %v813_v60 = vpack.c.bf16 %v733_v56, %v732_v55  ;;  %v494_v0 = vadd.f32 %v3788_v44, %v493_v58  ;;  %v738_v13 = vmax.f32 %v502_v3, 0.0 }
  0xe1   : > { %v3102_v63 = vpop.f32.mrf.mxu0  ;;  %v3821_v17 = vpop.f32.mrf.mxu1 }
  0xe2   : > { %v505_v1 = vadd.f32 %v3102_v63, %v3788_v44  ;;  %3175 = vmatprep.mubr.bf16.mxu1 %v813_v60  ;;  %v736_v10 = vmax.f32 %v494_v0, 0.0 }
  0xe3   : > { %v496_v4 = vpop.f32.mrf.mxu0  ;;  %3176 = vmatmul.mubr.bf16.vlgmr.msra.gmra.mxu1 %v814_v62  ;;  %v3825_v22 = vpop.f32.mrf.mxu1 }
  0xe4   : > { %v497_v6 = vadd.f32 %v3788_v44, %v496_v4  ;;  %v739_v8 = vmax.f32 %v505_v1, 0.0 }
  0xe5   : > { %v3105_v9 = vpop.f32.mrf.mxu0  ;;  %v3832_v27 = vpop.f32.mrf.mxu1 }
  0xe6   : > { %v737_v11 = vmax.f32 %v497_v6, 0.0  ;;  %v816_v18 = vpack.c.bf16 %v739_v8, %v738_v13  ;;  %v518_v23 = vadd.f32 %v3105_v9, %v3788_v44 }
  0xe7   : > { %v509_v14 = vpop.f32.mrf.mxu0  ;;  %v3834_v32 = vpop.f32.mrf.mxu1 }
  0xe8   : > { %v815_v16 = vpack.c.bf16 %v737_v11, %v736_v10  ;;  %v510_v20 = vadd.f32 %v3788_v44, %v509_v14  ;;  %v742_v33 = vmax.f32 %v518_v23, 0.0 }
  0xe9   : > { %v3106_v19 = vpop.f32.mrf.mxu0  ;;  %v3839_v37 = vpop.f32.mrf.mxu1 }
  0xea   : > { %v521_v21 = vadd.f32 %v3106_v19, %v3788_v44  ;;  %3179 = vmatprep.mubr.bf16.mxu1 %v815_v16  ;;  %v740_v30 = vmax.f32 %v510_v20, 0.0 }
  0xeb   : > { %v512_v24 = vpop.f32.mrf.mxu0  ;;  %3180 = vmatmul.mubr.bf16.gmra.mxu1 %v816_v18  ;;  %v3843_v42 = vpop.f32.mrf.mxu1 }
  0xec   : > { %v513_v26 = vadd.f32 %v3788_v44, %v512_v24  ;;  %v743_v28 = vmax.f32 %v521_v21, 0.0 }
  0xed   : > { %v3109_v29 = vpop.f32.mrf.mxu0  ;;  %v3847_v47 = vpop.f32.mrf.mxu1 }
  0xee   : > { %v741_v31 = vmax.f32 %v513_v26, 0.0  ;;  %v818_v38 = vpack.c.bf16 %v743_v28, %v742_v33  ;;  %v534_v43 = vadd.f32 %v3109_v29, %v3788_v44 }
  0xef   : > { %v525_v34 = vpop.f32.mrf.mxu0  ;;  %v3849_v52 = vpop.f32.mrf.mxu1 }
  0xf0   : > { %v817_v36 = vpack.c.bf16 %v741_v31, %v740_v30  ;;  %v526_v40 = vadd.f32 %v3788_v44, %v525_v34  ;;  %v746_v53 = vmax.f32 %v534_v43, 0.0 }
  0xf1   : > { %v3110_v39 = vpop.f32.mrf.mxu0  ;;  %v3851_v58 = vpop.f32.mrf.mxu1 }
  0xf2   : > { %v537_v41 = vadd.f32 %v3110_v39, %v3788_v44  ;;  %3183 = vmatprep.mubr.bf16.mxu1 %v817_v36  ;;  %v744_v50 = vmax.f32 %v526_v40, 0.0 }
  0xf3   : > { %v528_v45 = vpop.f32.mrf.mxu0  ;;  %3184 = vmatmul.mubr.bf16.gmra.mxu1 %v818_v38  ;;  %v3857_v4 = vpop.f32.mrf.mxu1 }
  0xf4   : > { %v529_v46 = vadd.f32 %v3788_v44, %v528_v45  ;;  %v747_v48 = vmax.f32 %v537_v41, 0.0 }
  0xf5   : > { %v3113_v49 = vpop.f32.mrf.mxu0  ;;  %v3859_v14 = vpop.f32.mrf.mxu1 }
  0xf6   : > { %v745_v51 = vmax.f32 %v529_v46, 0.0  ;;  %v820_v56 = vpack.c.bf16 %v747_v48, %v746_v53  ;;  %v550_v62 = vadd.f32 %v3113_v49, %v3788_v44  ;;  %v606_v53 = vadd.f32 %v3788_v44, %v3807_v2 }
  0xf7   : > { %v541_v54 = vpop.f32.mrf.mxu0  ;;  %v3865_v24 = vpop.f32.mrf.mxu1 }
  0xf8   : > { %v819_v55 = vpack.c.bf16 %v745_v51, %v744_v50  ;;  %v542_v59 = vadd.f32 %v3788_v44, %v541_v54  ;;  %v750_v8 = vmax.f32 %v550_v62, 0.0  ;;  %v609_v54 = vadd.f32 %v3788_v44, %v3816_v12 }
  0xf9   : > { %v3114_v57 = vpop.f32.mrf.mxu0  ;;  %v3867_v34 = vpop.f32.mrf.mxu1 }
  0xfa   : > { %v553_v60 = vadd.f32 %v3114_v57, %v3788_v44  ;;  %3187 = vmatprep.mubr.bf16.mxu1 %v819_v55  ;;  %v748_v5 = vmax.f32 %v542_v59, 0.0  ;;  %v765_v2 = vmax.f32 %v609_v54, 0.0  ;;  %v665_v54 = vadd.f32 %v3859_v14, %v3788_v44 }
  0xfb   : > { %v544_v63 = vpop.f32.mrf.mxu0  ;;  %3188 = vmatmul.mubr.bf16.gmra.mxu1 %v820_v56  ;;  %v3873_v45 = vpop.f32.mrf.mxu1 }
  0xfc   : > { %v545_v0 = vadd.f32 %v3788_v44, %v544_v63  ;;  %v751_v1 = vmax.f32 %v553_v60, 0.0 }
  0xfd   : > { %v3117_v3 = vpop.f32.mrf.mxu0  ;;  %v3879_v57 = vpop.f32.mrf.mxu1 }
  0xfe   : > { %v749_v6 = vmax.f32 %v545_v0, 0.0  ;;  %v822_v11 = vpack.c.bf16 %v751_v1, %v750_v8  ;;  %v566_v18 = vadd.f32 %v3117_v3, %v3788_v44  ;;  %v764_v0 = vmax.f32 %v606_v53, 0.0 }
  0xff   : > { %v557_v9 = vpop.f32.mrf.mxu0  ;;  %v662_v53 = vadd.f32 %v3851_v58, %v3788_v44  ;;  %v678_v58 = vadd.f32 %v3867_v34, %v3788_v44  ;;  %v681_v14 = vadd.f32 %v3879_v57, %v3788_v44 }
 0x100   : > { %v821_v10 = vpack.c.bf16 %v749_v6, %v748_v5  ;;  %v558_v15 = vadd.f32 %v3788_v44, %v557_v9  ;;  %v754_v28 = vmax.f32 %v566_v18, 0.0  ;;  %v672_v5 = vpop.f32.mrf.mxu1  ;;  %v617_v18 = vadd.f32 %v3814_v7, %v3788_v44 }
 0x101   : > { %v3118_v13 = vpop.f32.mrf.mxu0  ;;  %v630_v7 = vadd.f32 %v3821_v17, %v3788_v44  ;;  %v646_v17 = vadd.f32 %v3839_v37, %v3788_v44  ;;  %v670_v37 = vadd.f32 %v3788_v44, %v3873_v45 }
 0x102   : > { %v569_v16 = vadd.f32 %v3118_v13, %v3788_v44  ;;  %3191 = vmatprep.mubr.bf16.mxu1 %v821_v10  ;;  %v752_v25 = vmax.f32 %v558_v15, 0.0  ;;  %v829_v10 = vpack.c.bf16 %v765_v2, %v764_v0  ;;  %v625_v13 = vadd.f32 %v3788_v44, %v3834_v32 }
 0x103   : > { %v560_v19 = vpop.f32.mrf.mxu0  ;;  %3192 = vmatmul.mubr.bf16.gmra.mxu1 %v822_v11  ;;  %v622_v11 = vadd.f32 %v3788_v44, %v3825_v22  ;;  %v614_v15 = vadd.f32 %v3803_v61, %v3788_v44  ;;  %v638_v32 = vadd.f32 %v3788_v44, %v3843_v42  ;;  %v641_v61 = vadd.f32 %v3788_v44, %v3849_v52 }
 0x104   : > { %v561_v20 = vadd.f32 %v3788_v44, %v560_v19  ;;  %v755_v21 = vmax.f32 %v569_v16, 0.0  ;;  %v3893_v19 = vpop.f32.mrf.mxu1  ;;  %v654_v42 = vadd.f32 %v3788_v44, %v3857_v4  ;;  %v657_v52 = vadd.f32 %v3788_v44, %v3865_v24 }
 0x105   : > { %v3121_v23 = vpop.f32.mrf.mxu0  ;;  %v774_v4 = vmax.f32 %v646_v17, 0.0  ;;  %v694_v34 = vadd.f32 %v3893_v19, %v3788_v44 }
 0x106   : > { %v753_v26 = vmax.f32 %v561_v20, 0.0  ;;  %v824_v31 = vpack.c.bf16 %v755_v21, %v754_v28  ;;  %v582_v38 = vadd.f32 %v3121_v23, %v3788_v44  ;;  %v768_v20 = vmax.f32 %v622_v11, 0.0  ;;  %v685_v22 = vpop.f32.mrf.mxu1 }
 0x107   : > { %v573_v29 = vpop.f32.mrf.mxu0  ;;  %v769_v21 = vmax.f32 %v625_v13, 0.0  ;;  %v766_v23 = vmax.f32 %v614_v15, 0.0  ;;  %v686_v45 = vadd.f32 %v3788_v44, %v685_v22 }
 0x108   : > { %v823_v30 = vpack.c.bf16 %v753_v26, %v752_v25  ;;  %v574_v35 = vadd.f32 %v3788_v44, %v573_v29  ;;  %v758_v49 = vmax.f32 %v582_v38, 0.0  ;;  %v767_v25 = vmax.f32 %v617_v18, 0.0 }
 0x109   : > { %v3122_v33 = vpop.f32.mrf.mxu0  ;;  %v831_v26 = vpack.c.bf16 %v769_v21, %v768_v20  ;;  %v633_v29 = vadd.f32 %v3832_v27, %v3788_v44  ;;  %v649_v27 = vadd.f32 %v3847_v47, %v3788_v44  ;;  %v673_v47 = vadd.f32 %v3788_v44, %v672_v5 }
 0x10a   : > { %v585_v36 = vadd.f32 %v3122_v33, %v3788_v44  ;;  %3195 = vmatprep.mubr.bf16.mxu1 %v823_v30  ;;  %v756_v46 = vmax.f32 %v574_v35, 0.0  ;;  %v830_v28 = vpack.c.bf16 %v767_v25, %v766_v23  ;;  %v3150_v30 = vpop.f32.mrf.mxu1  ;;  %v773_v33 = vmax.f32 %v641_v61, 0.0 }
 0x10b   : > { %v576_v39 = vpop.f32.mrf.mxu0  ;;  %3196 = vmatmul.mubr.bf16.gmra.mxu1 %v824_v31  ;;  %v772_v31 = vmax.f32 %v638_v32, 0.0  ;;  %v770_v35 = vmax.f32 %v630_v7, 0.0  ;;  %v784_v5 = vmax.f32 %v686_v45, 0.0  ;;  %v786_v21 = vmax.f32 %v694_v34, 0.0 }
 0x10c   : > { %v577_v40 = vadd.f32 %v3788_v44, %v576_v39  ;;  %v759_v41 = vmax.f32 %v585_v36, 0.0  ;;  %v771_v36 = vmax.f32 %v633_v29, 0.0  ;;  %v688_v38 = vpop.f32.mrf.mxu1 }
 0x10d   : > { %v3125_v43 = vpop.f32.mrf.mxu0  ;;  %v833_v39 = vpack.c.bf16 %v773_v33, %v772_v31 }
 0x10e   : > { %v757_v48 = vmax.f32 %v577_v40, 0.0  ;;  %v826_v55 = vpack.c.bf16 %v759_v41, %v758_v49  ;;  %v598_v62 = vadd.f32 %v3125_v43, %v3788_v44  ;;  %v832_v40 = vpack.c.bf16 %v771_v36, %v770_v35  ;;  %v3153_v41 = vpop.f32.mrf.mxu1  ;;  %v3348_v43 = vld [vmem:[%s4632_s3] sm:$0xff]  }
 0x10f   : > { %v589_v50 = vpop.f32.mrf.mxu0  ;;  %v775_v49 = vmax.f32 %v649_v27, 0.0  ;;  %3253 = vmatprep.subr.bf16.mxu0 %v3348_v43  ;;  %v3941_v27 = vld [vmem:[%s4631_s2 + $0x1] ss:$0 sm:$0xff] }
 0x110   : > { %v825_v51 = vpack.c.bf16 %v757_v48, %v756_v46  ;;  %v590_v59 = vadd.f32 %v3788_v44, %v589_v50  ;;  %v762_v8 = vmax.f32 %v598_v62, 0.0  ;;  %v776_v46 = vmax.f32 %v654_v42, 0.0  ;;  %v701_v50 = vpop.f32.mrf.mxu1  ;;  %3254 = vmatpush3.bf16.msra.mxu0 %v3348_v43 }
 0x111   : > { %v3126_v56 = vpop.f32.mrf.mxu0  ;;  %v777_v48 = vmax.f32 %v657_v52, 0.0  ;;  %v779_v62 = vmax.f32 %v665_v54, 0.0  ;;  %v702_v11 = vadd.f32 %v3788_v44, %v701_v50 }
 0x112   : > { %v601_v60 = vadd.f32 %v3126_v56, %v3788_v44  ;;  %3199 = vmatprep.mubr.bf16.mxu1 %v825_v51  ;;  %v760_v12 = vmax.f32 %v590_v59, 0.0  ;;  %v834_v51 = vpack.c.bf16 %v775_v49, %v774_v4  ;;  %v780_v56 = vmax.f32 %v670_v37, 0.0 }
 0x113   : > { %v592_v63 = vpop.f32.mrf.mxu0  ;;  %3200 = vmatmul.mubr.bf16.gmra.mxu1 %v826_v55  ;;  %v835_v24 = vpack.c.bf16 %v777_v48, %v776_v46  ;;  %v3154_v55 = vpop.f32.mrf.mxu1  ;;  %v781_v59 = vmax.f32 %v673_v47, 0.0  ;;  %v788_v18 = vmax.f32 %v702_v11, 0.0 }
 0x114   : > { %v593_v1 = vadd.f32 %v3788_v44, %v592_v63  ;;  %v763_v3 = vmax.f32 %v601_v60, 0.0  ;;  %v778_v60 = vmax.f32 %v662_v53, 0.0  ;;  %v713_v19 = vadd.f32 %v3154_v55, %v3788_v44 }
 0x115   : > { %v704_v63 = vpop.f32.mrf.mxu1  ;;  %v837_v0 = vpack.c.bf16 %v781_v59, %v780_v56 }
 0x116   : > { %v761_v6 = vmax.f32 %v593_v1, 0.0  ;;  %v828_v16 = vpack.c.bf16 %v763_v3, %v762_v8  ;;  %v689_v1 = vadd.f32 %v3788_v44, %v688_v38  ;;  %v836_v2 = vpack.c.bf16 %v779_v62, %v778_v60 }
 0x117   : > { %v3157_v3 = vpop.f32.mrf.mxu1  ;;  %v783_v8 = vmax.f32 %v681_v14, 0.0  ;;  %v705_v13 = vadd.f32 %v3788_v44, %v704_v63  ;;  %v791_v31 = vmax.f32 %v713_v19, 0.0 }
 0x118   : > { %v827_v9 = vpack.c.bf16 %v761_v6, %v760_v12  ;;  %v785_v12 = vmax.f32 %v689_v1, 0.0  ;;  %v782_v6 = vmax.f32 %v678_v58, 0.0  ;;  %v726_v36 = vadd.f32 %v3157_v3, %v3788_v44 }
 0x119   : > { %v789_v20 = vmax.f32 %v705_v13, 0.0 }
 0x11a   : > { %3203 = vmatprep.mubr.bf16.mxu1 %v827_v9  ;;  %v717_v9 = vpop.f32.mrf.mxu1  ;;  %v838_v15 = vpack.c.bf16 %v783_v8, %v782_v6 }
 0x11b   : > { %3204 = vmatmul.mubr.bf16.gmra.mxu1 %v828_v16  ;;  %v697_v16 = vadd.f32 %v3150_v30, %v3788_v44  ;;  %v841_v22 = vpack.c.bf16 %v789_v20, %v788_v18 }
 0x11c   : > { %3207 = vmatprep.mubr.bf16.mxu1 %v829_v10  ;;  %v839_v10 = vpack.c.bf16 %v785_v12, %v784_v5  ;;  %v3158_v57 = vpop.f32.mrf.mxu1 }
 0x11d   : > { %v787_v23 = vmax.f32 %v697_v16, 0.0  ;;  %v729_v38 = vadd.f32 %v3158_v57, %v3788_v44 }
 0x11e   : > { %v720_v25 = vpop.f32.mrf.mxu1 }
 0x11f   : > { %v721_v32 = vadd.f32 %v3788_v44, %v720_v25  ;;  %v840_v61 = vpack.c.bf16 %v787_v23, %v786_v21  ;;  %v795_v42 = vmax.f32 %v729_v38, 0.0 }
 0x121   : > { %v793_v29 = vmax.f32 %v721_v32, 0.0 }
 0x123   : > { %3208 = vmatmul.mubr.bf16.gmra.mxu1 %v830_v28  ;;  %v710_v28 = vadd.f32 %v3153_v41, %v3788_v44 }
 0x124   : > { %3211 = vmatprep.mubr.bf16.mxu1 %v831_v26  ;;  %v718_v26 = vadd.f32 %v3788_v44, %v717_v9 }
 0x125   : > { %v790_v30 = vmax.f32 %v710_v28, 0.0 }
 0x126   : > { %v792_v7 = vmax.f32 %v718_v26, 0.0 }
 0x127   : > { %v842_v35 = vpack.c.bf16 %v791_v31, %v790_v30 }
 0x128   : > { %v843_v33 = vpack.c.bf16 %v793_v29, %v792_v7 }
 0x12b   : > { %3212 = vmatmul.mubr.bf16.gmra.mxu1 %v832_v40 }
 0x12c   : > { %3215 = vmatprep.mubr.bf16.mxu1 %v833_v39  ;;  %v794_v39 = vmax.f32 %v726_v36, 0.0 }
 0x12e   : > { %v844_v52 = vpack.c.bf16 %v795_v42, %v794_v39 }
 0x133   : > { %3216 = vmatmul.mubr.bf16.gmra.mxu1 %v834_v51 }
 0x134   : > { %3219 = vmatprep.mubr.bf16.mxu1 %v835_v24 }
 0x13b   : > { %3220 = vmatmul.mubr.bf16.gmra.mxu1 %v836_v2 }
 0x13c   : > { %3223 = vmatprep.mubr.bf16.mxu1 %v837_v0 }
 0x143   : > { %3224 = vmatmul.mubr.bf16.gmra.mxu1 %v838_v15 }
 0x144   : > { %3227 = vmatprep.mubr.bf16.mxu1 %v839_v10 }
 0x14b   : > { %3228 = vmatmul.mubr.bf16.gmra.mxu1 %v840_v61 }
 0x14c   : > { %3231 = vmatprep.mubr.bf16.mxu1 %v841_v22 }
 0x153   : > { %3232 = vmatmul.mubr.bf16.gmra.mxu1 %v842_v35 }
 0x154   : > { %3235 = vmatprep.mubr.bf16.mxu1 %v843_v33 }
 0x15b   : > { %3236 = vmatmul.mubr.bf16.gmra.mxu1 %v844_v52 }
 0x1a3   : > { %v3177_v40 = vpop.f32.mrf.mxu1 }
 0x1a4   : > { %v940_v44 = vadd.f32 %v3177_v40, %v3941_v27 }
 0x1a5   : > { %v931_v17 = vpop.f32.mrf.mxu1 }
 0x1a6   : > { %v932_v43 = vadd.f32 %v3941_v27, %v931_v17  ;;  %v1188_v47 = vmax.f32 %v940_v44, 0.0 }
 0x1a7   : > { %v3178_v41 = vpop.f32.mrf.mxu1 }
 0x1a8   : > { %v943_v46 = vadd.f32 %v3178_v41, %v3941_v27  ;;  %v1186_v24 = vmax.f32 %v932_v43, 0.0 }
 0x1a9   : > { %v934_v48 = vpop.f32.mrf.mxu1 }
 0x1aa   : > { %v935_v4 = vadd.f32 %v3941_v27, %v934_v48  ;;  %v1189_v49 = vmax.f32 %v943_v46, 0.0 }
 0x1ab   : > { %v3181_v50 = vpop.f32.mrf.mxu1 }
 0x1ac   : > { %v1187_v37 = vmax.f32 %v935_v4, 0.0  ;;  %v1251_v54 = vpack.c.bf16 %v1189_v49, %v1188_v47  ;;  %v956_v60 = vadd.f32 %v3181_v50, %v3941_v27 }
 0x1ad   : > { %v947_v51 = vpop.f32.mrf.mxu1 }
 0x1ae   : > { %v1250_v53 = vpack.c.bf16 %v1187_v37, %v1186_v24  ;;  %v948_v56 = vadd.f32 %v3941_v27, %v947_v51  ;;  %v1192_v58 = vmax.f32 %v956_v60, 0.0 }
 0x1af   : > { %v3182_v55 = vpop.f32.mrf.mxu1 }
 0x1b0   : > { %v959_v59 = vadd.f32 %v3182_v55, %v3941_v27  ;;  %3255 = vmatprep.mubr.bf16.mxu0 %v1250_v53  ;;  %v1190_v1 = vmax.f32 %v948_v56, 0.0 }
 0x1b1   : > { %v950_v62 = vpop.f32.mrf.mxu1  ;;  %3256 = vmatmul.mubr.bf16.vlgmr.msra.gmra.mxu0 %v1251_v54 }
 0x1b2   : > { %v951_v63 = vadd.f32 %v3941_v27, %v950_v62  ;;  %v1193_v0 = vmax.f32 %v959_v59, 0.0 }
 0x1b3   : > { %v3185_v45 = vpop.f32.mrf.mxu1 }
 0x1b4   : > { %v1191_v2 = vmax.f32 %v951_v63, 0.0  ;;  %v1253_v5 = vpack.c.bf16 %v1193_v0, %v1192_v58  ;;  %v972_v9 = vadd.f32 %v3185_v45, %v3941_v27 }
 0x1b5   : > { %v963_v14 = vpop.f32.mrf.mxu1 }
 0x1b6   : > { %v1252_v3 = vpack.c.bf16 %v1191_v2, %v1190_v1  ;;  %v964_v6 = vadd.f32 %v3941_v27, %v963_v14  ;;  %v1196_v57 = vmax.f32 %v972_v9, 0.0 }
 0x1b7   : > { %v3186_v12 = vpop.f32.mrf.mxu1 }
 0x1b8   : > { %v975_v8 = vadd.f32 %v3186_v12, %v3941_v27  ;;  %3259 = vmatprep.mubr.bf16.mxu0 %v1252_v3  ;;  %v1194_v34 = vmax.f32 %v964_v6, 0.0 }
 0x1b9   : > { %v966_v10 = vpop.f32.mrf.mxu1  ;;  %3260 = vmatmul.mubr.bf16.gmra.mxu0 %v1253_v5 }
 0x1ba   : > { %v967_v11 = vadd.f32 %v3941_v27, %v966_v10  ;;  %v1197_v13 = vmax.f32 %v975_v8, 0.0 }
 0x1bb   : > { %v3189_v15 = vpop.f32.mrf.mxu1 }
 0x1bc   : > { %v1195_v16 = vmax.f32 %v967_v11, 0.0  ;;  %v1255_v21 = vpack.c.bf16 %v1197_v13, %v1196_v57  ;;  %v988_v26 = vadd.f32 %v3189_v15, %v3941_v27 }
 0x1bd   : > { %v979_v18 = vpop.f32.mrf.mxu1 }
 0x1be   : > { %v1254_v20 = vpack.c.bf16 %v1195_v16, %v1194_v34  ;;  %v980_v25 = vadd.f32 %v3941_v27, %v979_v18  ;;  %v1200_v30 = vmax.f32 %v988_v26, 0.0 }
 0x1bf   : > { %v3190_v23 = vpop.f32.mrf.mxu1 }
 0x1c0   : > { %v991_v22 = vadd.f32 %v3190_v23, %v3941_v27  ;;  %3263 = vmatprep.mubr.bf16.mxu0 %v1254_v20  ;;  %v1198_v7 = vmax.f32 %v980_v25, 0.0 }
 0x1c1   : > { %v982_v32 = vpop.f32.mrf.mxu1  ;;  %3264 = vmatmul.mubr.bf16.gmra.mxu0 %v1255_v21 }
 0x1c2   : > { %v983_v61 = vadd.f32 %v3941_v27, %v982_v32  ;;  %v1201_v28 = vmax.f32 %v991_v22, 0.0 }
 0x1c3   : > { %v3193_v19 = vpop.f32.mrf.mxu1 }
 0x1c4   : > { %v1199_v29 = vmax.f32 %v983_v61, 0.0  ;;  %v1257_v35 = vpack.c.bf16 %v1201_v28, %v1200_v30  ;;  %v1004_v42 = vadd.f32 %v3193_v19, %v3941_v27 }
 0x1c5   : > { %v995_v31 = vpop.f32.mrf.mxu1 }
 0x1c6   : > { %v1256_v33 = vpack.c.bf16 %v1199_v29, %v1198_v7  ;;  %v996_v38 = vadd.f32 %v3941_v27, %v995_v31  ;;  %v1204_v44 = vmax.f32 %v1004_v42, 0.0 }
 0x1c7   : > { %v3194_v36 = vpop.f32.mrf.mxu1 }
 0x1c8   : > { %v1007_v39 = vadd.f32 %v3194_v36, %v3941_v27  ;;  %3267 = vmatprep.mubr.bf16.mxu0 %v1256_v33  ;;  %v1202_v43 = vmax.f32 %v996_v38, 0.0 }
 0x1c9   : > { %v998_v52 = vpop.f32.mrf.mxu1  ;;  %3268 = vmatmul.mubr.bf16.gmra.mxu0 %v1257_v35 }
 0x1ca   : > { %v999_v40 = vadd.f32 %v3941_v27, %v998_v52  ;;  %v1205_v17 = vmax.f32 %v1007_v39, 0.0 }
 0x1cb   : > { %v3197_v41 = vpop.f32.mrf.mxu1 }
 0x1cc   : > { %v1203_v46 = vmax.f32 %v999_v40, 0.0  ;;  %v1259_v49 = vpack.c.bf16 %v1205_v17, %v1204_v44  ;;  %v1020_v47 = vadd.f32 %v3197_v41, %v3941_v27 }
 0x1cd   : > { %v1011_v48 = vpop.f32.mrf.mxu1 }
 0x1ce   : > { %v1258_v4 = vpack.c.bf16 %v1203_v46, %v1202_v43  ;;  %v1012_v24 = vadd.f32 %v3941_v27, %v1011_v48  ;;  %v1208_v60 = vmax.f32 %v1020_v47, 0.0 }
 0x1cf   : > { %v3198_v50 = vpop.f32.mrf.mxu1 }
 0x1d0   : > { %v1023_v37 = vadd.f32 %v3198_v50, %v3941_v27  ;;  %3271 = vmatprep.mubr.bf16.mxu0 %v1258_v4  ;;  %v1206_v56 = vmax.f32 %v1012_v24, 0.0 }
 0x1d1   : > { %v1014_v51 = vpop.f32.mrf.mxu1  ;;  %3272 = vmatmul.mubr.bf16.gmra.mxu0 %v1259_v49 }
 0x1d2   : > { %v1015_v53 = vadd.f32 %v3941_v27, %v1014_v51  ;;  %v1209_v54 = vmax.f32 %v1023_v37, 0.0 }
 0x1d3   : > { %v3201_v55 = vpop.f32.mrf.mxu1 }
 0x1d4   : > { %v1207_v59 = vmax.f32 %v1015_v53, 0.0  ;;  %v1261_v0 = vpack.c.bf16 %v1209_v54, %v1208_v60  ;;  %v1036_v58 = vadd.f32 %v3201_v55, %v3941_v27 }
 0x1d5   : > { %v1027_v62 = vpop.f32.mrf.mxu1 }
 0x1d6   : > { %v1260_v63 = vpack.c.bf16 %v1207_v59, %v1206_v56  ;;  %v1028_v1 = vadd.f32 %v3941_v27, %v1027_v62  ;;  %v1212_v9 = vmax.f32 %v1036_v58, 0.0 }
 0x1d7   : > { %v3202_v45 = vpop.f32.mrf.mxu1 }
 0x1d8   : > { %v1039_v2 = vadd.f32 %v3202_v45, %v3941_v27  ;;  %3275 = vmatprep.mubr.bf16.mxu0 %v1260_v63  ;;  %v1210_v6 = vmax.f32 %v1028_v1, 0.0 }
 0x1d9   : > { %v1030_v14 = vpop.f32.mrf.mxu1  ;;  %3276 = vmatmul.mubr.bf16.gmra.mxu0 %v1261_v0 }
 0x1da   : > { %v1031_v3 = vadd.f32 %v3941_v27, %v1030_v14  ;;  %v1213_v5 = vmax.f32 %v1039_v2, 0.0 }
 0x1db   : > { %v3205_v12 = vpop.f32.mrf.mxu1 }
 0x1dc   : > { %v1211_v8 = vmax.f32 %v1031_v3, 0.0  ;;  %v1263_v13 = vpack.c.bf16 %v1213_v5, %v1212_v9  ;;  %v1052_v57 = vadd.f32 %v3205_v12, %v3941_v27 }
 0x1dd   : > { %v1043_v10 = vpop.f32.mrf.mxu1 }
 0x1de   : > { %v1262_v11 = vpack.c.bf16 %v1211_v8, %v1210_v6  ;;  %v1044_v34 = vadd.f32 %v3941_v27, %v1043_v10  ;;  %v1216_v26 = vmax.f32 %v1052_v57, 0.0 }
 0x1df   : > { %v3206_v15 = vpop.f32.mrf.mxu1 }
 0x1e0   : > { %v1055_v16 = vadd.f32 %v3206_v15, %v3941_v27  ;;  %3279 = vmatprep.mubr.bf16.mxu0 %v1262_v11  ;;  %v1214_v25 = vmax.f32 %v1044_v34, 0.0 }
 0x1e1   : > { %v1046_v18 = vpop.f32.mrf.mxu1  ;;  %3280 = vmatmul.mubr.bf16.gmra.mxu0 %v1263_v13 }
 0x1e2   : > { %v1047_v20 = vadd.f32 %v3941_v27, %v1046_v18  ;;  %v1217_v21 = vmax.f32 %v1055_v16, 0.0 }
 0x1e3   : > { %v3209_v23 = vpop.f32.mrf.mxu1 }
 0x1e4   : > { %v1215_v22 = vmax.f32 %v1047_v20, 0.0  ;;  %v1265_v28 = vpack.c.bf16 %v1217_v21, %v1216_v26  ;;  %v1068_v30 = vadd.f32 %v3209_v23, %v3941_v27 }
 0x1e5   : > { %v1059_v32 = vpop.f32.mrf.mxu1 }
 0x1e6   : > { %v1264_v61 = vpack.c.bf16 %v1215_v22, %v1214_v25  ;;  %v1060_v7 = vadd.f32 %v3941_v27, %v1059_v32  ;;  %v1220_v42 = vmax.f32 %v1068_v30, 0.0 }
 0x1e7   : > { %v3210_v19 = vpop.f32.mrf.mxu1 }
 0x1e8   : > { %v1071_v29 = vadd.f32 %v3210_v19, %v3941_v27  ;;  %3283 = vmatprep.mubr.bf16.mxu0 %v1264_v61  ;;  %v1218_v38 = vmax.f32 %v1060_v7, 0.0 }
 0x1e9   : > { %v1062_v31 = vpop.f32.mrf.mxu1  ;;  %3284 = vmatmul.mubr.bf16.gmra.mxu0 %v1265_v28 }
 0x1ea   : > { %v1063_v33 = vadd.f32 %v3941_v27, %v1062_v31  ;;  %v1221_v35 = vmax.f32 %v1071_v29, 0.0 }
 0x1eb   : > { %v3213_v36 = vpop.f32.mrf.mxu1 }
 0x1ec   : > { %v1219_v39 = vmax.f32 %v1063_v33, 0.0  ;;  %v1267_v17 = vpack.c.bf16 %v1221_v35, %v1220_v42  ;;  %v1084_v44 = vadd.f32 %v3213_v36, %v3941_v27 }
 0x1ed   : > { %v1075_v52 = vpop.f32.mrf.mxu1 }
 0x1ee   : > { %v1266_v40 = vpack.c.bf16 %v1219_v39, %v1218_v38  ;;  %v1076_v43 = vadd.f32 %v3941_v27, %v1075_v52  ;;  %v1224_v47 = vmax.f32 %v1084_v44, 0.0 }
 0x1ef   : > { %v3214_v41 = vpop.f32.mrf.mxu1 }
 0x1f0   : > { %v1087_v46 = vadd.f32 %v3214_v41, %v3941_v27  ;;  %3287 = vmatprep.mubr.bf16.mxu0 %v1266_v40  ;;  %v1222_v24 = vmax.f32 %v1076_v43, 0.0 }
 0x1f1   : > { %v1078_v48 = vpop.f32.mrf.mxu1  ;;  %3288 = vmatmul.mubr.bf16.gmra.mxu0 %v1267_v17 }
 0x1f2   : > { %v1079_v4 = vadd.f32 %v3941_v27, %v1078_v48  ;;  %v1225_v49 = vmax.f32 %v1087_v46, 0.0 }
 0x1f3   : > { %v3217_v50 = vpop.f32.mrf.mxu1 }
 0x1f4   : > { %v1223_v37 = vmax.f32 %v1079_v4, 0.0  ;;  %v1269_v54 = vpack.c.bf16 %v1225_v49, %v1224_v47  ;;  %v1100_v60 = vadd.f32 %v3217_v50, %v3941_v27 }
 0x1f5   : > { %v1091_v51 = vpop.f32.mrf.mxu1 }
 0x1f6   : > { %v1268_v53 = vpack.c.bf16 %v1223_v37, %v1222_v24  ;;  %v1092_v56 = vadd.f32 %v3941_v27, %v1091_v51  ;;  %v1228_v58 = vmax.f32 %v1100_v60, 0.0 }
 0x1f7   : > { %v3218_v55 = vpop.f32.mrf.mxu1 }
 0x1f8   : > { %v1103_v59 = vadd.f32 %v3218_v55, %v3941_v27  ;;  %3291 = vmatprep.mubr.bf16.mxu0 %v1268_v53  ;;  %v1226_v1 = vmax.f32 %v1092_v56, 0.0 }
 0x1f9   : > { %v1094_v62 = vpop.f32.mrf.mxu1  ;;  %3292 = vmatmul.mubr.bf16.gmra.mxu0 %v1269_v54 }
 0x1fa   : > { %v1095_v63 = vadd.f32 %v3941_v27, %v1094_v62  ;;  %v1229_v0 = vmax.f32 %v1103_v59, 0.0 }
 0x1fb   : > { %v3221_v45 = vpop.f32.mrf.mxu1 }
 0x1fc   : > { %v1227_v2 = vmax.f32 %v1095_v63, 0.0  ;;  %v1271_v5 = vpack.c.bf16 %v1229_v0, %v1228_v58  ;;  %v1116_v9 = vadd.f32 %v3221_v45, %v3941_v27 }
 0x1fd   : > { %v1107_v14 = vpop.f32.mrf.mxu1 }
 0x1fe   : > { %v1270_v3 = vpack.c.bf16 %v1227_v2, %v1226_v1  ;;  %v1108_v6 = vadd.f32 %v3941_v27, %v1107_v14  ;;  %v1232_v57 = vmax.f32 %v1116_v9, 0.0 }
 0x1ff   : > { %v3222_v12 = vpop.f32.mrf.mxu1 }
 0x200   : > { %v1119_v8 = vadd.f32 %v3222_v12, %v3941_v27  ;;  %3295 = vmatprep.mubr.bf16.mxu0 %v1270_v3  ;;  %v1230_v34 = vmax.f32 %v1108_v6, 0.0 }
 0x201   : > { %v1110_v10 = vpop.f32.mrf.mxu1  ;;  %3296 = vmatmul.mubr.bf16.gmra.mxu0 %v1271_v5 }
 0x202   : > { %v1111_v11 = vadd.f32 %v3941_v27, %v1110_v10  ;;  %v1233_v13 = vmax.f32 %v1119_v8, 0.0 }
 0x203   : > { %v3225_v15 = vpop.f32.mrf.mxu1 }
 0x204   : > { %v1231_v16 = vmax.f32 %v1111_v11, 0.0  ;;  %v1273_v21 = vpack.c.bf16 %v1233_v13, %v1232_v57  ;;  %v1132_v26 = vadd.f32 %v3225_v15, %v3941_v27  ;;  %v4010_v11 = vld [vmem:[%s4633_s4] ss:$0 sm:$0xff] }
 0x205   : > { %v1123_v18 = vpop.f32.mrf.mxu1 }
 0x206   : > { %v1272_v20 = vpack.c.bf16 %v1231_v16, %v1230_v34  ;;  %v1124_v25 = vadd.f32 %v3941_v27, %v1123_v18  ;;  %v1236_v30 = vmax.f32 %v1132_v26, 0.0 }
 0x207   : > { %v3226_v23 = vpop.f32.mrf.mxu1 }
 0x208   : > { %v1135_v22 = vadd.f32 %v3226_v23, %v3941_v27  ;;  %3299 = vmatprep.mubr.bf16.mxu0 %v1272_v20  ;;  %v1234_v7 = vmax.f32 %v1124_v25, 0.0 }
 0x209   : > { %v1126_v32 = vpop.f32.mrf.mxu1  ;;  %3300 = vmatmul.mubr.bf16.gmra.mxu0 %v1273_v21 }
 0x20a   : > { %v1127_v61 = vadd.f32 %v3941_v27, %v1126_v32  ;;  %v1237_v28 = vmax.f32 %v1135_v22, 0.0 }
 0x20b   : > { %v3229_v19 = vpop.f32.mrf.mxu1 }
 0x20c   : > { %v1235_v29 = vmax.f32 %v1127_v61, 0.0  ;;  %v1275_v35 = vpack.c.bf16 %v1237_v28, %v1236_v30  ;;  %v1148_v42 = vadd.f32 %v3229_v19, %v3941_v27 }
 0x20d   : > { %v1139_v31 = vpop.f32.mrf.mxu1 }
 0x20e   : > { %v1274_v33 = vpack.c.bf16 %v1235_v29, %v1234_v7  ;;  %v1140_v38 = vadd.f32 %v3941_v27, %v1139_v31  ;;  %v1240_v44 = vmax.f32 %v1148_v42, 0.0 }
 0x20f   : > { %v3230_v36 = vpop.f32.mrf.mxu1 }
 0x210   : > { %v1151_v39 = vadd.f32 %v3230_v36, %v3941_v27  ;;  %3303 = vmatprep.mubr.bf16.mxu0 %v1274_v33  ;;  %v1238_v43 = vmax.f32 %v1140_v38, 0.0 }
 0x211   : > { %v1142_v52 = vpop.f32.mrf.mxu1  ;;  %3304 = vmatmul.mubr.bf16.gmra.mxu0 %v1275_v35 }
 0x212   : > { %v1143_v40 = vadd.f32 %v3941_v27, %v1142_v52  ;;  %v1241_v17 = vmax.f32 %v1151_v39, 0.0 }
 0x213   : > { %v3233_v41 = vpop.f32.mrf.mxu1 }
 0x214   : > { %v1239_v46 = vmax.f32 %v1143_v40, 0.0  ;;  %v1277_v49 = vpack.c.bf16 %v1241_v17, %v1240_v44  ;;  %v1164_v47 = vadd.f32 %v3233_v41, %v3941_v27 }
 0x215   : > { %v1155_v48 = vpop.f32.mrf.mxu1 }
 0x216   : > { %v1276_v4 = vpack.c.bf16 %v1239_v46, %v1238_v43  ;;  %v1156_v24 = vadd.f32 %v3941_v27, %v1155_v48  ;;  %v1244_v60 = vmax.f32 %v1164_v47, 0.0 }
 0x217   : > { %v3234_v50 = vpop.f32.mrf.mxu1 }
 0x218   : > { %v1167_v37 = vadd.f32 %v3234_v50, %v3941_v27  ;;  %3307 = vmatprep.mubr.bf16.mxu0 %v1276_v4  ;;  %v1242_v56 = vmax.f32 %v1156_v24, 0.0 }
 0x219   : > { %v1158_v51 = vpop.f32.mrf.mxu1  ;;  %3308 = vmatmul.mubr.bf16.gmra.mxu0 %v1277_v49 }
 0x21a   : > { %v1159_v53 = vadd.f32 %v3941_v27, %v1158_v51  ;;  %v1245_v54 = vmax.f32 %v1167_v37, 0.0 }
 0x21b   : > { %v3237_v55 = vpop.f32.mrf.mxu1 }
 0x21c   : > { %v1243_v59 = vmax.f32 %v1159_v53, 0.0  ;;  %v1279_v0 = vpack.c.bf16 %v1245_v54, %v1244_v60  ;;  %v1180_v58 = vadd.f32 %v3237_v55, %v3941_v27 }
 0x21d   : > { %v1171_v62 = vpop.f32.mrf.mxu1 }
 0x21e   : > { %v1278_v63 = vpack.c.bf16 %v1243_v59, %v1242_v56  ;;  %v1172_v1 = vadd.f32 %v3941_v27, %v1171_v62  ;;  %v1248_v8 = vmax.f32 %v1180_v58, 0.0 }
 0x21f   : > { %v3238_v45 = vpop.f32.mrf.mxu1 }
 0x220   : > { %v1183_v2 = vadd.f32 %v3238_v45, %v3941_v27  ;;  %3311 = vmatprep.mubr.bf16.mxu0 %v1278_v63  ;;  %v1246_v12 = vmax.f32 %v1172_v1, 0.0 }
 0x221   : > { %v1174_v14 = vpop.f32.mrf.mxu1  ;;  %3312 = vmatmul.mubr.bf16.gmra.mxu0 %v1279_v0 }
 0x222   : > { %v1175_v3 = vadd.f32 %v3941_v27, %v1174_v14  ;;  %v1249_v5 = vmax.f32 %v1183_v2, 0.0 }
 0x224   : > { %v1247_v6 = vmax.f32 %v1175_v3, 0.0  ;;  %v1281_v10 = vpack.c.bf16 %v1249_v5, %v1248_v8 }
 0x226   : > { %v1280_v9 = vpack.c.bf16 %v1247_v6, %v1246_v12 }
 0x228   : > { %3315 = vmatprep.mubr.bf16.mxu0 %v1280_v9 }
 0x229   : > { %3316 = vmatmul.mubr.bf16.gmra.mxu0 %v1281_v10 }
 0x271   : > { %v3257_v13 = vpop.f32.mrf.mxu0 }
 0x272   : > { %v4013_v15 = vadd.f32 %v3257_v13, %v4010_v11 }
 0x273   : > { %v1387_v34 = vpop.f32.mrf.mxu0 }
 0x274   : > { %v4016_v27 = vadd.f32 %v4010_v11, %v1387_v34  ;;  %1646 = vmax.xlane.f32.xlu1 %v4013_v15 }
 0x275   : > { %v3258_v16 = vpop.f32.mrf.mxu0 }
 0x276   : > { %v4020_v57 = vadd.f32 %v3258_v16, %v4010_v11  ;;  %1642 = vmax.xlane.f32.xlu0 %v4016_v27 }
 0x277   : > { %v1390_v18 = vpop.f32.mrf.mxu0 }
 0x278   : > { %v4024_v20 = vadd.f32 %v4010_v11, %v1390_v18  ;;  %1648 = vmax.xlane.f32.xlu1 %v4020_v57 }
 0x279   : > { %v3261_v21 = vpop.f32.mrf.mxu0 }
 0x27a   : > { %1644 = vmax.xlane.f32.xlu0 %v4024_v20  ;;  %v4029_v25 = vadd.f32 %v3261_v21, %v4010_v11 }
 0x27b   : > { %v1403_v23 = vpop.f32.mrf.mxu0 }
 0x27c   : > { %v4036_v61 = vadd.f32 %v4010_v11, %v1403_v23 }
 0x27d   : > { %v3262_v22 = vpop.f32.mrf.mxu0 }
 0x27e   : > { %v4032_v26 = vadd.f32 %v3262_v22, %v4010_v11  ;;  %1654 = vmax.xlane.f32.xlu0 %v4029_v25 }
 0x27f   : > { %v1406_v32 = vpop.f32.mrf.mxu0 }
 0x280   : > { %1656 = vmax.xlane.f32.xlu1 %v4032_v26  ;;  %v4040_v19 = vadd.f32 %v4010_v11, %v1406_v32 }
 0x281   : > { %v3265_v28 = vpop.f32.mrf.mxu0 }
 0x282   : > { %1650 = vmax.xlane.f32.xlu0 %v4036_v61  ;;  %v4044_v29 = vadd.f32 %v3265_v28, %v4010_v11 }
 0x283   : > { %v1419_v7 = vpop.f32.mrf.mxu0 }
 0x284   : > { %1652 = vmax.xlane.f32.xlu1 %v4040_v19  ;;  %v4052_v35 = vadd.f32 %v4010_v11, %v1419_v7 }
 0x285   : > { %v3266_v30 = vpop.f32.mrf.mxu0 }
 0x286   : > { %v4048_v31 = vadd.f32 %v3266_v30, %v4010_v11  ;;  %1662 = vmax.xlane.f32.xlu0 %v4044_v29 }
 0x287   : > { %v1422_v33 = vpop.f32.mrf.mxu0 }
 0x288   : > { %1664 = vmax.xlane.f32.xlu1 %v4048_v31  ;;  %v4056_v38 = vadd.f32 %v4010_v11, %v1422_v33 }
 0x289   : > { %v3269_v36 = vpop.f32.mrf.mxu0 }
 0x28a   : > { %1658 = vmax.xlane.f32.xlu0 %v4052_v35  ;;  %v4060_v42 = vadd.f32 %v3269_v36, %v4010_v11 }
 0x28b   : > { %v1435_v39 = vpop.f32.mrf.mxu0 }
 0x28c   : > { %1660 = vmax.xlane.f32.xlu1 %v4056_v38  ;;  %v4068_v41 = vadd.f32 %v4010_v11, %v1435_v39 }
 0x28d   : > { %v3270_v52 = vpop.f32.mrf.mxu0 }
 0x28e   : > { %v4064_v40 = vadd.f32 %v3270_v52, %v4010_v11  ;;  %1670 = vmax.xlane.f32.xlu0 %v4060_v42 }
 0x28f   : > { %v1438_v17 = vpop.f32.mrf.mxu0 }
 0x290   : > { %1672 = vmax.xlane.f32.xlu1 %v4064_v40  ;;  %v4072_v46 = vadd.f32 %v4010_v11, %v1438_v17 }
 0x291   : > { %v3273_v43 = vpop.f32.mrf.mxu0 }
 0x292   : > { %1666 = vmax.xlane.f32.xlu0 %v4068_v41  ;;  %v4076_v48 = vadd.f32 %v3273_v43, %v4010_v11 }
 0x293   : > { %v1451_v44 = vpop.f32.mrf.mxu0 }
 0x294   : > { %1668 = vmax.xlane.f32.xlu1 %v4072_v46  ;;  %v4084_v24 = vadd.f32 %v4010_v11, %v1451_v44 }
 0x295   : > { %v3274_v4 = vpop.f32.mrf.mxu0 }
 0x296   : > { %v4080_v49 = vadd.f32 %v3274_v4, %v4010_v11  ;;  %1678 = vmax.xlane.f32.xlu0 %v4076_v48 }
 0x297   : > { %v1454_v50 = vpop.f32.mrf.mxu0 }
 0x298   : > { %1680 = vmax.xlane.f32.xlu1 %v4080_v49  ;;  %v4088_v47 = vadd.f32 %v4010_v11, %v1454_v50 }
 0x299   : > { %v3277_v37 = vpop.f32.mrf.mxu0 }
 0x29a   : > { %1674 = vmax.xlane.f32.xlu0 %v4084_v24  ;;  %v4092_v53 = vadd.f32 %v3277_v37, %v4010_v11 }
 0x29b   : > { %v1467_v51 = vpop.f32.mrf.mxu0 }
 0x29c   : > { %1676 = vmax.xlane.f32.xlu1 %v4088_v47  ;;  %v4100_v59 = vadd.f32 %v4010_v11, %v1467_v51 }
 0x29d   : > { %v3278_v54 = vpop.f32.mrf.mxu0 }
 0x29e   : > { %v4096_v55 = vadd.f32 %v3278_v54, %v4010_v11  ;;  %1686 = vmax.xlane.f32.xlu0 %v4092_v53 }
 0x29f   : > { %v1470_v56 = vpop.f32.mrf.mxu0 }
 0x2a0   : > { %1688 = vmax.xlane.f32.xlu1 %v4096_v55  ;;  %v4104_v62 = vadd.f32 %v4010_v11, %v1470_v56 }
 0x2a1   : > { %v3281_v60 = vpop.f32.mrf.mxu0 }
 0x2a2   : > { %1682 = vmax.xlane.f32.xlu0 %v4100_v59  ;;  %v4108_v0 = vadd.f32 %v3281_v60, %v4010_v11 }
 0x2a3   : > { %v1483_v63 = vpop.f32.mrf.mxu0 }
 0x2a4   : > { %1684 = vmax.xlane.f32.xlu1 %v4104_v62  ;;  %v4116_v58 = vadd.f32 %v4010_v11, %v1483_v63 }
 0x2a5   : > { %v3282_v45 = vpop.f32.mrf.mxu0 }
 0x2a6   : > { %v4112_v1 = vadd.f32 %v3282_v45, %v4010_v11  ;;  %1694 = vmax.xlane.f32.xlu0 %v4108_v0 }
 0x2a7   : > { %v1486_v2 = vpop.f32.mrf.mxu0 }
 0x2a8   : > { %1696 = vmax.xlane.f32.xlu1 %v4112_v1  ;;  %v4120_v3 = vadd.f32 %v4010_v11, %v1486_v2 }
 0x2a9   : > { %v3285_v14 = vpop.f32.mrf.mxu0 }
 0x2aa   : > { %1690 = vmax.xlane.f32.xlu0 %v4116_v58  ;;  %v4124_v12 = vadd.f32 %v3285_v14, %v4010_v11 }
 0x2ab   : > { %v1499_v5 = vpop.f32.mrf.mxu0 }
 0x2ac   : > { %1692 = vmax.xlane.f32.xlu1 %v4120_v3  ;;  %v4132_v10 = vadd.f32 %v4010_v11, %v1499_v5 }
 0x2ad   : > { %v3286_v6 = vpop.f32.mrf.mxu0 }
 0x2ae   : > { %v4128_v8 = vadd.f32 %v3286_v6, %v4010_v11  ;;  %1702 = vmax.xlane.f32.xlu0 %v4124_v12 }
 0x2af   : > { %v1502_v9 = vpop.f32.mrf.mxu0 }
 0x2b0   : > { %1704 = vmax.xlane.f32.xlu1 %v4128_v8  ;;  %v4136_v34 = vadd.f32 %v4010_v11, %v1502_v9 }
 0x2b1   : > { %v3289_v13 = vpop.f32.mrf.mxu0 }
 0x2b2   : > { %1698 = vmax.xlane.f32.xlu0 %v4132_v10  ;;  %v4140_v18 = vadd.f32 %v3289_v13, %v4010_v11 }
 0x2b3   : > { %v1515_v16 = vpop.f32.mrf.mxu0 }
 0x2b4   : > { %1700 = vmax.xlane.f32.xlu1 %v4136_v34  ;;  %v4148_v32 = vadd.f32 %v4010_v11, %v1515_v16 }
 0x2b5   : > { %v3290_v21 = vpop.f32.mrf.mxu0 }
 0x2b6   : > { %v4144_v23 = vadd.f32 %v3290_v21, %v4010_v11  ;;  %1710 = vmax.xlane.f32.xlu0 %v4140_v18 }
 0x2b7   : > { %v1518_v22 = vpop.f32.mrf.mxu0 }
 0x2b8   : > { %1712 = vmax.xlane.f32.xlu1 %v4144_v23  ;;  %v4152_v7 = vadd.f32 %v4010_v11, %v1518_v22 }
 0x2b9   : > { %v3293_v28 = vpop.f32.mrf.mxu0 }
 0x2ba   : > { %1706 = vmax.xlane.f32.xlu0 %v4148_v32  ;;  %v4156_v33 = vadd.f32 %v3293_v28, %v4010_v11 }
 0x2bb   : > { %v1531_v30 = vpop.f32.mrf.mxu0 }
 0x2bc   : > { %1708 = vmax.xlane.f32.xlu1 %v4152_v7  ;;  %v4164_v17 = vadd.f32 %v4010_v11, %v1531_v30 }
 0x2bd   : > { %v3294_v36 = vpop.f32.mrf.mxu0 }
 0x2be   : > { %v4160_v39 = vadd.f32 %v3294_v36, %v4010_v11  ;;  %1718 = vmax.xlane.f32.xlu0 %v4156_v33 }
 0x2bf   : > { %v1534_v52 = vpop.f32.mrf.mxu0 }
 0x2c0   : > { %1720 = vmax.xlane.f32.xlu1 %v4160_v39  ;;  %v4168_v44 = vadd.f32 %v4010_v11, %v1534_v52 }
 0x2c1   : > { %v3297_v43 = vpop.f32.mrf.mxu0 }
 0x2c2   : > { %1714 = vmax.xlane.f32.xlu0 %v4164_v17  ;;  %v4172_v50 = vadd.f32 %v3297_v43, %v4010_v11 }
 0x2c3   : > { %v1547_v4 = vpop.f32.mrf.mxu0 }
 0x2c4   : > { %1716 = vmax.xlane.f32.xlu1 %v4168_v44  ;;  %v4180_v56 = vadd.f32 %v4010_v11, %v1547_v4 }
 0x2c5   : > { %v3298_v37 = vpop.f32.mrf.mxu0 }
 0x2c6   : > { %v4176_v51 = vadd.f32 %v3298_v37, %v4010_v11  ;;  %1726 = vmax.xlane.f32.xlu0 %v4172_v50 }
 0x2c7   : > { %v1550_v54 = vpop.f32.mrf.mxu0 }
 0x2c8   : > { %1728 = vmax.xlane.f32.xlu1 %v4176_v51  ;;  %v4184_v63 = vadd.f32 %v4010_v11, %v1550_v54 }
 0x2c9   : > { %v3301_v60 = vpop.f32.mrf.mxu0 }
 0x2ca   : > { %1722 = vmax.xlane.f32.xlu0 %v4180_v56  ;;  %v4188_v2 = vadd.f32 %v3301_v60, %v4010_v11 }
 0x2cb   : > { %v1563_v45 = vpop.f32.mrf.mxu0 }
 0x2cc   : > { %1724 = vmax.xlane.f32.xlu1 %v4184_v63  ;;  %v4196_v9 = vadd.f32 %v4010_v11, %v1563_v45 }
 0x2cd   : > { %v3302_v14 = vpop.f32.mrf.mxu0 }
 0x2ce   : > { %v4192_v5 = vadd.f32 %v3302_v14, %v4010_v11  ;;  %1734 = vmax.xlane.f32.xlu0 %v4188_v2 }
 0x2cf   : > { %v1566_v6 = vpop.f32.mrf.mxu0 }
 0x2d0   : > { %1736 = vmax.xlane.f32.xlu1 %v4192_v5  ;;  %v4200_v16 = vadd.f32 %v4010_v11, %v1566_v6 }
 0x2d1   : > { %v3305_v13 = vpop.f32.mrf.mxu0 }
 0x2d2   : > { %1730 = vmax.xlane.f32.xlu0 %v4196_v9  ;;  %v4204_v22 = vadd.f32 %v3305_v13, %v4010_v11 }
 0x2d3   : > { %v1579_v21 = vpop.f32.mrf.mxu0 }
 0x2d4   : > { %1732 = vmax.xlane.f32.xlu1 %v4200_v16  ;;  %v4212_v52 = vadd.f32 %v4010_v11, %v1579_v21 }
 0x2d5   : > { %v3306_v28 = vpop.f32.mrf.mxu0 }
 0x2d6   : > { %v4208_v30 = vadd.f32 %v3306_v28, %v4010_v11  ;;  %1742 = vmax.xlane.f32.xlu0 %v4204_v22  ;;  %4662 = vst [vmem:[#allocation2_spill] sm:$0xff] %v4212_v52 }
 0x2d7   : > { %v1582_v36 = vpop.f32.mrf.mxu0 }
 0x2d8   : > { %1744 = vmax.xlane.f32.xlu1 %v4208_v30  ;;  %v4216_v4 = vadd.f32 %v4010_v11, %v1582_v36 }
 0x2d9   : > { %v3309_v43 = vpop.f32.mrf.mxu0 }
 0x2da   : > { %4663 = vst [vmem:[#allocation3_spill] sm:$0xff] %v4216_v4  ;;  %1738 = vmax.xlane.f32.xlu0 %v4212_v52  ;;  %v4220_v54 = vadd.f32 %v3309_v43, %v4010_v11 }
 0x2db   : > { %v1595_v37 = vpop.f32.mrf.mxu0 }
 0x2dc   : > { %4664 = vst [vmem:[#allocation4_spill] sm:$0xff] %v4220_v54  ;;  %1740 = vmax.xlane.f32.xlu1 %v4216_v4  ;;  %v4228_v6 = vadd.f32 %v4010_v11, %v1595_v37 }
 0x2dd   : > { %v3310_v60 = vpop.f32.mrf.mxu0 }
 0x2de   : > { %v4224_v45 = vadd.f32 %v3310_v60, %v4010_v11  ;;  %1750 = vmax.xlane.f32.xlu0 %v4220_v54  ;;  %4666 = vst [vmem:[#allocation6_spill] sm:$0xff] %v4228_v6 }
 0x2df   : > { %v1598_v14 = vpop.f32.mrf.mxu0 }
 0x2e0   : > { %4665 = vst [vmem:[#allocation5_spill] sm:$0xff] %v4224_v45  ;;  %1752 = vmax.xlane.f32.xlu1 %v4224_v45  ;;  %v4232_v21 = vadd.f32 %v4010_v11, %v1598_v14 }
 0x2e1   : > { %v3313_v13 = vpop.f32.mrf.mxu0 }
 0x2e2   : > { %4667 = vst [vmem:[#allocation7_spill] sm:$0xff] %v4232_v21  ;;  %1746 = vmax.xlane.f32.xlu0 %v4228_v6  ;;  %v4236_v36 = vadd.f32 %v3313_v13, %v4010_v11 }
 0x2e3   : > { %v1611_v28 = vpop.f32.mrf.mxu0 }
 0x2e4   : > { %4668 = vst [vmem:[#allocation8_spill] sm:$0xff] %v4236_v36  ;;  %1748 = vmax.xlane.f32.xlu1 %v4232_v21  ;;  %v4244_v45 = vadd.f32 %v4010_v11, %v1611_v28 }
 0x2e5   : > { %v3314_v43 = vpop.f32.mrf.mxu0 }
 0x2e6   : > { %v4240_v60 = vadd.f32 %v3314_v43, %v4010_v11  ;;  %1758 = vmax.xlane.f32.xlu0 %v4236_v36  ;;  %4670 = vst [vmem:[#allocation10_spill] sm:$0xff] %v4244_v45 }
 0x2e7   : > { %v1614_v37 = vpop.f32.mrf.mxu0 }
 0x2e8   : > { %4669 = vst [vmem:[#allocation9_spill] sm:$0xff] %v4240_v60  ;;  %1760 = vmax.xlane.f32.xlu1 %v4240_v60  ;;  %v4248_v6 = vadd.f32 %v4010_v11, %v1614_v37 }
 0x2e9   : > { %v3317_v14 = vpop.f32.mrf.mxu0 }
 0x2ea   : > { %4671 = vst [vmem:[#allocation11_spill] sm:$0xff] %v4248_v6  ;;  %1754 = vmax.xlane.f32.xlu0 %v4244_v45  ;;  %v4252_v21 = vadd.f32 %v3317_v14, %v4010_v11 }
 0x2eb   : > { %v1627_v13 = vpop.f32.mrf.mxu0 }
 0x2ec   : > { %4672 = vst [vmem:[#allocation12_spill] sm:$0xff] %v4252_v21  ;;  %1756 = vmax.xlane.f32.xlu1 %v4248_v6  ;;  %v4260_v60 = vadd.f32 %v4010_v11, %v1627_v13 }
 0x2ed   : > { %v3318_v43 = vpop.f32.mrf.mxu0 }
 0x2ee   : > { %v4256_v36 = vadd.f32 %v3318_v43, %v4010_v11  ;;  %1766 = vmax.xlane.f32.xlu0 %v4252_v21  ;;  %4674 = vst [vmem:[#allocation14_spill] sm:$0xff] %v4260_v60 }
 0x2ef   : > { %v1630_v28 = vpop.f32.mrf.mxu0 }
 0x2f0   : > { %4673 = vst [vmem:[#allocation13_spill] sm:$0xff] %v4256_v36  ;;  %1768 = vmax.xlane.f32.xlu1 %v4256_v36  ;;  %v4264_v37 = vadd.f32 %v4010_v11, %v1630_v28 }
 0x2f2   : > { %4675 = vst [vmem:[#allocation15_spill] sm:$0xff] %v4264_v37  ;;  %1762 = vmax.xlane.f32.xlu0 %v4260_v60 }
 0x2f4   : > { %1764 = vmax.xlane.f32.xlu1 %v4264_v37 }
 0x2fd   : > { %v1647_v14 = vpop.xlane.xlu1 %1646 }
 0x2fe   : > { %v1772_v6 = vsub.f32 %v4013_v15, %v1647_v14 }
 0x2ff   : > { %v1643_v43 = vpop.xlane.xlu0 %1642 }
 0x300   : > { %v1838_v45 = vmul.f32 1.442695, %v1772_v6  ;;  %v1770_v21 = vsub.f32 %v4016_v27, %v1643_v43 }
 0x301   : > { %v1649_v54 = vpop.xlane.xlu1 %1648 }
 0x302   : > { %3349 = vpow2.f32 %v1838_v45  ;;  %v1834_v13 = vmul.f32 1.442695, %v1770_v21  ;;  %v1773_v4 = vsub.f32 %v4020_v57, %v1649_v54 }
 0x303   : > { %v1645_v36 = vpop.xlane.xlu0 %1644 }
 0x304   : > { %v1840_v52 = vmul.f32 1.442695, %v1773_v4  ;;  %v1771_v11 = vsub.f32 %v4024_v20, %v1645_v36  ;;  %3351 = vpow2.f32 %v1834_v13 }
 0x306   : > { %3353 = vpow2.f32 %v1840_v52  ;;  %v1836_v28 = vmul.f32 1.442695, %v1771_v11 }
 0x307   : > { %v1655_v37 = vpop.xlane.xlu0 %1654 }
 0x308   : > { %v1776_v60 = vsub.f32 %v4029_v25, %v1655_v37  ;;  %3355 = vpow2.f32 %v1836_v28 }
 0x309   : > { %v1657_v15 = vpop.xlane.xlu1 %1656 }
 0x30a   : > { %v1846_v6 = vmul.f32 1.442695, %v1776_v60  ;;  %v1777_v27 = vsub.f32 %v4032_v26, %v1657_v15 }
 0x30b   : > { %v1651_v14 = vpop.xlane.xlu0 %1650 }
 0x30c   : > { %3357 = vpow2.f32 %v1846_v6  ;;  %v1848_v45 = vmul.f32 1.442695, %v1777_v27  ;;  %v1774_v57 = vsub.f32 %v4036_v61, %v1651_v14 }
 0x30d   : > { %v1653_v54 = vpop.xlane.xlu1 %1652 }
 0x30e   : > { %3359 = vpow2.f32 %v1848_v45  ;;  %v1842_v4 = vmul.f32 1.442695, %v1774_v57  ;;  %v1775_v20 = vsub.f32 %v4040_v19, %v1653_v54 }
 0x30f   : > { %v4276_v52 = vpop.eup %3349  ;;  %v1663_v21 = vpop.xlane.xlu0 %1662 }
 0x310   : > { %3361 = vpow2.f32 %v1842_v4  ;;  %v1844_v25 = vmul.f32 1.442695, %v1775_v20  ;;  %v1780_v36 = vsub.f32 %v4044_v29, %v1663_v21  ;;  %1966 = vadd.xlane.f32.xlu0 %v4276_v52 }
 0x311   : > { %v1665_v26 = vpop.xlane.xlu1 %1664  ;;  %v4280_v60 = vpop.eup %3351 }
 0x312   : > { %3363 = vpow2.f32 %v1844_v25  ;;  %v1854_v37 = vmul.f32 1.442695, %v1780_v36  ;;  %v1781_v61 = vsub.f32 %v4048_v31, %v1665_v26 }
 0x313   : > { %v4283_v43 = vpop.eup %3353  ;;  %v1659_v13 = vpop.xlane.xlu0 %1658 }
 0x314   : > { %3365 = vpow2.f32 %v1854_v37  ;;  %v1856_v19 = vmul.f32 1.442695, %v1781_v61  ;;  %v1778_v11 = vsub.f32 %v4052_v35, %v1659_v13  ;;  %1968 = vadd.xlane.f32.xlu1 %v4283_v43  ;;  %1962 = vadd.xlane.f32.xlu0 %v4280_v60 }
 0x315   : > { %v1661_v29 = vpop.xlane.xlu1 %1660  ;;  %v4289_v6 = vpop.eup %3355 }
 0x316   : > { %3367 = vpow2.f32 %v1856_v19  ;;  %v1850_v28 = vmul.f32 1.442695, %v1778_v11  ;;  %v1779_v15 = vsub.f32 %v4056_v38, %v1661_v29 }
 0x317   : > { %v1671_v27 = vpop.xlane.xlu0 %1670 }
 0x318   : > { %3369 = vpow2.f32 %v1850_v28  ;;  %v1852_v31 = vmul.f32 1.442695, %v1779_v15  ;;  %v1784_v14 = vsub.f32 %v4060_v42, %v1671_v27  ;;  %1964 = vadd.xlane.f32.xlu1 %v4289_v6 }
 0x319   : > { %v4293_v45 = vpop.eup %3357  ;;  %v1673_v35 = vpop.xlane.xlu1 %1672 }
 0x31a   : > { %3371 = vpow2.f32 %v1852_v31  ;;  %v1862_v57 = vmul.f32 1.442695, %v1784_v14  ;;  %v1785_v54 = vsub.f32 %v4064_v40, %v1673_v35  ;;  %1974 = vadd.xlane.f32.xlu0 %v4293_v45 }
 0x31b   : > { %v4297_v4 = vpop.eup %3359  ;;  %v1667_v38 = vpop.xlane.xlu0 %1666 }
 0x31c   : > { %3373 = vpow2.f32 %v1862_v57  ;;  %v1864_v20 = vmul.f32 1.442695, %v1785_v54  ;;  %v1782_v21 = vsub.f32 %v4068_v41, %v1667_v38  ;;  %1976 = vadd.xlane.f32.xlu1 %v4297_v4 }
 0x31d   : > { %v4301_v42 = vpop.eup %3361  ;;  %v1669_v25 = vpop.xlane.xlu1 %1668 }
 0x31e   : > { %3375 = vpow2.f32 %v1864_v20  ;;  %v1858_v36 = vmul.f32 1.442695, %v1782_v21  ;;  %v1783_v26 = vsub.f32 %v4072_v46, %v1669_v25  ;;  %1970 = vadd.xlane.f32.xlu0 %v4301_v42 }
 0x31f   : > { %v4305_v40 = vpop.eup %3363  ;;  %v1679_v37 = vpop.xlane.xlu0 %1678 }
 0x320   : > { %3377 = vpow2.f32 %v1858_v36  ;;  %v1860_v61 = vmul.f32 1.442695, %v1783_v26  ;;  %v1788_v13 = vsub.f32 %v4076_v48, %v1679_v37  ;;  %1972 = vadd.xlane.f32.xlu1 %v4305_v40 }
 0x321   : > { %v4309_v41 = vpop.eup %3365  ;;  %v1681_v19 = vpop.xlane.xlu1 %1680 }
 0x322   : > { %3379 = vpow2.f32 %v1860_v61  ;;  %v1870_v11 = vmul.f32 1.442695, %v1788_v13  ;;  %v1789_v29 = vsub.f32 %v4080_v49, %v1681_v19  ;;  %1982 = vadd.xlane.f32.xlu0 %v4309_v41 }
 0x323   : > { %v4313_v46 = vpop.eup %3367  ;;  %v1675_v28 = vpop.xlane.xlu0 %1674 }
 0x324   : > { %3381 = vpow2.f32 %v1870_v11  ;;  %v1872_v15 = vmul.f32 1.442695, %v1789_v29  ;;  %v1786_v27 = vsub.f32 %v4084_v24, %v1675_v28  ;;  %1984 = vadd.xlane.f32.xlu1 %v4313_v46 }
 0x325   : > { %v4317_v48 = vpop.eup %3369  ;;  %v1677_v31 = vpop.xlane.xlu1 %1676 }
 0x326   : > { %3383 = vpow2.f32 %v1872_v15  ;;  %v1866_v14 = vmul.f32 1.442695, %v1786_v27  ;;  %v1787_v35 = vsub.f32 %v4088_v47, %v1677_v31  ;;  %1978 = vadd.xlane.f32.xlu0 %v4317_v48 }
 0x327   : > { %v4321_v49 = vpop.eup %3371  ;;  %v1687_v57 = vpop.xlane.xlu0 %1686 }
 0x328   : > { %3385 = vpow2.f32 %v1866_v14  ;;  %v1868_v54 = vmul.f32 1.442695, %v1787_v35  ;;  %v1792_v38 = vsub.f32 %v4092_v53, %v1687_v57  ;;  %1980 = vadd.xlane.f32.xlu1 %v4321_v49 }
 0x329   : > { %v4325_v24 = vpop.eup %3373  ;;  %v1689_v20 = vpop.xlane.xlu1 %1688 }
 0x32a   : > { %3387 = vpow2.f32 %v1868_v54  ;;  %v1878_v21 = vmul.f32 1.442695, %v1792_v38  ;;  %v1793_v25 = vsub.f32 %v4096_v55, %v1689_v20  ;;  %1990 = vadd.xlane.f32.xlu0 %v4325_v24 }
 0x32b   : > { %v4329_v47 = vpop.eup %3375  ;;  %v1683_v36 = vpop.xlane.xlu0 %1682 }
 0x32c   : > { %3389 = vpow2.f32 %v1878_v21  ;;  %v1880_v26 = vmul.f32 1.442695, %v1793_v25  ;;  %v1790_v37 = vsub.f32 %v4100_v59, %v1683_v36  ;;  %1992 = vadd.xlane.f32.xlu1 %v4329_v47 }
 0x32d   : > { %v4333_v53 = vpop.eup %3377  ;;  %v1685_v61 = vpop.xlane.xlu1 %1684 }
 0x32e   : > { %3391 = vpow2.f32 %v1880_v26  ;;  %v1874_v13 = vmul.f32 1.442695, %v1790_v37  ;;  %v1791_v19 = vsub.f32 %v4104_v62, %v1685_v61  ;;  %1986 = vadd.xlane.f32.xlu0 %v4333_v53 }
 0x32f   : > { %v4337_v55 = vpop.eup %3379  ;;  %v1695_v11 = vpop.xlane.xlu0 %1694 }
 0x330   : > { %3393 = vpow2.f32 %v1874_v13  ;;  %v1876_v29 = vmul.f32 1.442695, %v1791_v19  ;;  %v1796_v28 = vsub.f32 %v4108_v0, %v1695_v11  ;;  %1988 = vadd.xlane.f32.xlu1 %v4337_v55 }
 0x331   : > { %v4341_v59 = vpop.eup %3381  ;;  %v1697_v15 = vpop.xlane.xlu1 %1696 }
 0x332   : > { %3395 = vpow2.f32 %v1876_v29  ;;  %v1886_v27 = vmul.f32 1.442695, %v1796_v28  ;;  %v1797_v31 = vsub.f32 %v4112_v1, %v1697_v15  ;;  %1998 = vadd.xlane.f32.xlu0 %v4341_v59 }
 0x333   : > { %v4345_v62 = vpop.eup %3383  ;;  %v1691_v14 = vpop.xlane.xlu0 %1690 }
 0x334   : > { %3397 = vpow2.f32 %v1886_v27  ;;  %v1888_v35 = vmul.f32 1.442695, %v1797_v31  ;;  %v1794_v57 = vsub.f32 %v4116_v58, %v1691_v14  ;;  %2000 = vadd.xlane.f32.xlu1 %v4345_v62 }
 0x335   : > { %v4349_v0 = vpop.eup %3385  ;;  %v1693_v54 = vpop.xlane.xlu1 %1692 }
 0x336   : > { %3399 = vpow2.f32 %v1888_v35  ;;  %v1882_v38 = vmul.f32 1.442695, %v1794_v57  ;;  %v1795_v20 = vsub.f32 %v4120_v3, %v1693_v54  ;;  %1994 = vadd.xlane.f32.xlu0 %v4349_v0 }
 0x337   : > { %v4353_v1 = vpop.eup %3387  ;;  %v1703_v21 = vpop.xlane.xlu0 %1702 }
 0x338   : > { %3401 = vpow2.f32 %v1882_v38  ;;  %v1884_v25 = vmul.f32 1.442695, %v1795_v20  ;;  %v1800_v36 = vsub.f32 %v4124_v12, %v1703_v21  ;;  %1996 = vadd.xlane.f32.xlu1 %v4353_v1 }
 0x339   : > { %v4357_v58 = vpop.eup %3389  ;;  %v1705_v26 = vpop.xlane.xlu1 %1704 }
 0x33a   : > { %3403 = vpow2.f32 %v1884_v25  ;;  %v1894_v37 = vmul.f32 1.442695, %v1800_v36  ;;  %v1801_v61 = vsub.f32 %v4128_v8, %v1705_v26  ;;  %2006 = vadd.xlane.f32.xlu0 %v4357_v58 }
 0x33b   : > { %v4361_v3 = vpop.eup %3391  ;;  %v1699_v13 = vpop.xlane.xlu0 %1698 }
 0x33c   : > { %3405 = vpow2.f32 %v1894_v37  ;;  %v1896_v19 = vmul.f32 1.442695, %v1801_v61  ;;  %v1798_v11 = vsub.f32 %v4132_v10, %v1699_v13  ;;  %2008 = vadd.xlane.f32.xlu1 %v4361_v3 }
 0x33d   : > { %v4365_v12 = vpop.eup %3393  ;;  %v1701_v29 = vpop.xlane.xlu1 %1700 }
 0x33e   : > { %3407 = vpow2.f32 %v1896_v19  ;;  %v1890_v28 = vmul.f32 1.442695, %v1798_v11  ;;  %v1799_v15 = vsub.f32 %v4136_v34, %v1701_v29  ;;  %2002 = vadd.xlane.f32.xlu0 %v4365_v12 }
 0x33f   : > { %v4369_v8 = vpop.eup %3395  ;;  %v1711_v27 = vpop.xlane.xlu0 %1710 }
 0x340   : > { %3409 = vpow2.f32 %v1890_v28  ;;  %v1892_v31 = vmul.f32 1.442695, %v1799_v15  ;;  %v1804_v14 = vsub.f32 %v4140_v18, %v1711_v27  ;;  %2004 = vadd.xlane.f32.xlu1 %v4369_v8 }
 0x341   : > { %v4373_v10 = vpop.eup %3397  ;;  %v1713_v35 = vpop.xlane.xlu1 %1712 }
 0x342   : > { %3411 = vpow2.f32 %v1892_v31  ;;  %v1902_v57 = vmul.f32 1.442695, %v1804_v14  ;;  %v1805_v54 = vsub.f32 %v4144_v23, %v1713_v35  ;;  %2014 = vadd.xlane.f32.xlu0 %v4373_v10 }
 0x343   : > { %v4377_v34 = vpop.eup %3399  ;;  %v1707_v38 = vpop.xlane.xlu0 %1706 }
 0x344   : > { %3413 = vpow2.f32 %v1902_v57  ;;  %v1904_v20 = vmul.f32 1.442695, %v1805_v54  ;;  %v1802_v21 = vsub.f32 %v4148_v32, %v1707_v38  ;;  %2016 = vadd.xlane.f32.xlu1 %v4377_v34 }
 0x345   : > { %v4381_v18 = vpop.eup %3401  ;;  %v1709_v25 = vpop.xlane.xlu1 %1708 }
 0x346   : > { %3415 = vpow2.f32 %v1904_v20  ;;  %v1898_v36 = vmul.f32 1.442695, %v1802_v21  ;;  %v1803_v26 = vsub.f32 %v4152_v7, %v1709_v25  ;;  %2010 = vadd.xlane.f32.xlu0 %v4381_v18 }
 0x347   : > { %v4385_v23 = vpop.eup %3403  ;;  %v1719_v37 = vpop.xlane.xlu0 %1718 }
 0x348   : > { %3417 = vpow2.f32 %v1898_v36  ;;  %v1900_v61 = vmul.f32 1.442695, %v1803_v26  ;;  %v1808_v13 = vsub.f32 %v4156_v33, %v1719_v37  ;;  %2012 = vadd.xlane.f32.xlu1 %v4385_v23 }
 0x349   : > { %v4389_v32 = vpop.eup %3405  ;;  %v1721_v19 = vpop.xlane.xlu1 %1720 }
 0x34a   : > { %3419 = vpow2.f32 %v1900_v61  ;;  %v1910_v11 = vmul.f32 1.442695, %v1808_v13  ;;  %v1809_v29 = vsub.f32 %v4160_v39, %v1721_v19  ;;  %2022 = vadd.xlane.f32.xlu0 %v4389_v32 }
 0x34b   : > { %v4393_v7 = vpop.eup %3407  ;;  %v1715_v28 = vpop.xlane.xlu0 %1714 }
 0x34c   : > { %3421 = vpow2.f32 %v1910_v11  ;;  %v1912_v15 = vmul.f32 1.442695, %v1809_v29  ;;  %v1806_v27 = vsub.f32 %v4164_v17, %v1715_v28  ;;  %2024 = vadd.xlane.f32.xlu1 %v4393_v7 }
 0x34d   : > { %v4397_v33 = vpop.eup %3409  ;;  %v1717_v31 = vpop.xlane.xlu1 %1716 }
 0x34e   : > { %3423 = vpow2.f32 %v1912_v15  ;;  %v1906_v14 = vmul.f32 1.442695, %v1806_v27  ;;  %v1807_v35 = vsub.f32 %v4168_v44, %v1717_v31  ;;  %2018 = vadd.xlane.f32.xlu0 %v4397_v33 }
 0x34f   : > { %v4401_v39 = vpop.eup %3411  ;;  %v1727_v57 = vpop.xlane.xlu0 %1726 }
 0x350   : > { %3425 = vpow2.f32 %v1906_v14  ;;  %v1908_v54 = vmul.f32 1.442695, %v1807_v35  ;;  %v1812_v38 = vsub.f32 %v4172_v50, %v1727_v57  ;;  %2020 = vadd.xlane.f32.xlu1 %v4401_v39 }
 0x351   : > { %v4405_v17 = vpop.eup %3413  ;;  %v1729_v20 = vpop.xlane.xlu1 %1728 }
 0x352   : > { %3427 = vpow2.f32 %v1908_v54  ;;  %v1918_v21 = vmul.f32 1.442695, %v1812_v38  ;;  %v1813_v25 = vsub.f32 %v4176_v51, %v1729_v20  ;;  %2030 = vadd.xlane.f32.xlu0 %v4405_v17 }
 0x353   : > { %v4409_v44 = vpop.eup %3415  ;;  %v1723_v36 = vpop.xlane.xlu0 %1722 }
 0x354   : > { %3429 = vpow2.f32 %v1918_v21  ;;  %v1920_v26 = vmul.f32 1.442695, %v1813_v25  ;;  %v1810_v37 = vsub.f32 %v4180_v56, %v1723_v36  ;;  %2032 = vadd.xlane.f32.xlu1 %v4409_v44 }
 0x355   : > { %v4413_v50 = vpop.eup %3417  ;;  %v1725_v61 = vpop.xlane.xlu1 %1724 }
 0x356   : > { %3431 = vpow2.f32 %v1920_v26  ;;  %v1914_v13 = vmul.f32 1.442695, %v1810_v37  ;;  %v1811_v19 = vsub.f32 %v4184_v63, %v1725_v61  ;;  %2026 = vadd.xlane.f32.xlu0 %v4413_v50 }
 0x357   : > { %v4417_v51 = vpop.eup %3419  ;;  %v1735_v11 = vpop.xlane.xlu0 %1734 }
 0x358   : > { %3433 = vpow2.f32 %v1914_v13  ;;  %v1916_v29 = vmul.f32 1.442695, %v1811_v19  ;;  %v1816_v28 = vsub.f32 %v4188_v2, %v1735_v11  ;;  %2028 = vadd.xlane.f32.xlu1 %v4417_v51  ;;  %v4676_v11 = vld [vmem:[#allocation2_spill] sm:$0xff] }
 0x359   : > { %v4421_v56 = vpop.eup %3421  ;;  %v1737_v15 = vpop.xlane.xlu1 %1736 }
 0x35a   : > { %3435 = vpow2.f32 %v1916_v29  ;;  %v1926_v27 = vmul.f32 1.442695, %v1816_v28  ;;  %v1817_v31 = vsub.f32 %v4192_v5, %v1737_v15  ;;  %2038 = vadd.xlane.f32.xlu0 %v4421_v56 }
 0x35b   : > { %v4425_v63 = vpop.eup %3423  ;;  %v1731_v14 = vpop.xlane.xlu0 %1730 }
 0x35c   : > { %3437 = vpow2.f32 %v1926_v27  ;;  %v1928_v35 = vmul.f32 1.442695, %v1817_v31  ;;  %v1814_v57 = vsub.f32 %v4196_v9, %v1731_v14  ;;  %2040 = vadd.xlane.f32.xlu1 %v4425_v63  ;;  %v4677_v27 = vld [vmem:[#allocation3_spill] sm:$0xff] }
 0x35d   : > { %v4429_v2 = vpop.eup %3425  ;;  %v1733_v54 = vpop.xlane.xlu1 %1732 }
 0x35e   : > { %3439 = vpow2.f32 %v1928_v35  ;;  %v1922_v38 = vmul.f32 1.442695, %v1814_v57  ;;  %v1815_v20 = vsub.f32 %v4200_v16, %v1733_v54  ;;  %2034 = vadd.xlane.f32.xlu0 %v4429_v2  ;;  %v4678_v57 = vld [vmem:[#allocation4_spill] sm:$0xff] }
 0x35f   : > { %v4433_v5 = vpop.eup %3427  ;;  %v1743_v21 = vpop.xlane.xlu0 %1742 }
 0x360   : > { %3441 = vpow2.f32 %v1922_v38  ;;  %v1924_v25 = vmul.f32 1.442695, %v1815_v20  ;;  %v1820_v36 = vsub.f32 %v4204_v22, %v1743_v21  ;;  %2036 = vadd.xlane.f32.xlu1 %v4433_v5 }
 0x361   : > { %v4437_v9 = vpop.eup %3429  ;;  %v1745_v26 = vpop.xlane.xlu1 %1744 }
 0x362   : > { %3443 = vpow2.f32 %v1924_v25  ;;  %v1934_v37 = vmul.f32 1.442695, %v1820_v36  ;;  %v1821_v61 = vsub.f32 %v4208_v30, %v1745_v26  ;;  %2046 = vadd.xlane.f32.xlu0 %v4437_v9  ;;  %v4679_v25 = vld [vmem:[#allocation5_spill] sm:$0xff] }
 0x363   : > { %v4441_v16 = vpop.eup %3431  ;;  %v1739_v13 = vpop.xlane.xlu0 %1738 }
 0x364   : > { %3445 = vpow2.f32 %v1934_v37  ;;  %v1936_v19 = vmul.f32 1.442695, %v1821_v61  ;;  %v1818_v29 = vsub.f32 %v4676_v11, %v1739_v13  ;;  %2048 = vadd.xlane.f32.xlu1 %v4441_v16  ;;  %v4680_v13 = vld [vmem:[#allocation6_spill] sm:$0xff] }
 0x365   : > { %v4445_v22 = vpop.eup %3433  ;;  %v1741_v28 = vpop.xlane.xlu1 %1740 }
 0x366   : > { %3447 = vpow2.f32 %v1936_v19  ;;  %v1930_v15 = vmul.f32 1.442695, %v1818_v29  ;;  %v1819_v31 = vsub.f32 %v4677_v27, %v1741_v28  ;;  %2042 = vadd.xlane.f32.xlu0 %v4445_v22 }
 0x367   : > { %v4449_v30 = vpop.eup %3435  ;;  %v1751_v14 = vpop.xlane.xlu0 %1750 }
 0x368   : > { %3449 = vpow2.f32 %v1930_v15  ;;  %v1932_v35 = vmul.f32 1.442695, %v1819_v31  ;;  %v1824_v54 = vsub.f32 %v4678_v57, %v1751_v14  ;;  %2044 = vadd.xlane.f32.xlu1 %v4449_v30  ;;  %v4682_v15 = vld [vmem:[#allocation7_spill] sm:$0xff]  ;;  %v4684_v57 = vld [vmem:[#allocation8_spill] sm:$0xff] }
 0x369   : > { %v4453_v38 = vpop.eup %3437  ;;  %v1753_v20 = vpop.xlane.xlu1 %1752 }
 0x36a   : > { %3451 = vpow2.f32 %v1932_v35  ;;  %v1942_v21 = vmul.f32 1.442695, %v1824_v54  ;;  %v1825_v36 = vsub.f32 %v4679_v25, %v1753_v20  ;;  %2054 = vadd.xlane.f32.xlu0 %v4453_v38 }
 0x36b   : > { %v4457_v26 = vpop.eup %3439  ;;  %v1747_v37 = vpop.xlane.xlu0 %1746 }
 0x36c   : > { %3453 = vpow2.f32 %v1942_v21  ;;  %v1944_v61 = vmul.f32 1.442695, %v1825_v36  ;;  %v1822_v19 = vsub.f32 %v4680_v13, %v1747_v37  ;;  %2056 = vadd.xlane.f32.xlu1 %v4457_v26  ;;  %v4686_v36 = vld [vmem:[#allocation9_spill] sm:$0xff] }
 0x36d   : > { %v4461_v11 = vpop.eup %3441  ;;  %v1749_v29 = vpop.xlane.xlu1 %1748 }
 0x36e   : > { %4681 = vst [vmem:[#allocation2_spill] sm:$0xff] %v4461_v11  ;;  %3455 = vpow2.f32 %v1944_v61  ;;  %v1938_v28 = vmul.f32 1.442695, %v1822_v19  ;;  %v1823_v27 = vsub.f32 %v4682_v15, %v1749_v29  ;;  %2050 = vadd.xlane.f32.xlu0 %v4461_v11  ;;  %v4688_v29 = vld [vmem:[#allocation10_spill] sm:$0xff] }
 0x36f   : > { %v4465_v31 = vpop.eup %3443  ;;  %v1759_v14 = vpop.xlane.xlu0 %1758 }
 0x370   : > { %4683 = vst [vmem:[#allocation3_spill] sm:$0xff] %v4465_v31  ;;  %3457 = vpow2.f32 %v1938_v28  ;;  %v1940_v35 = vmul.f32 1.442695, %v1823_v27  ;;  %v1828_v54 = vsub.f32 %v4684_v57, %v1759_v14  ;;  %2052 = vadd.xlane.f32.xlu1 %v4465_v31 }
 0x371   : > { %v4469_v20 = vpop.eup %3445  ;;  %v1761_v21 = vpop.xlane.xlu1 %1760 }
 0x372   : > { %4685 = vst [vmem:[#allocation4_spill] sm:$0xff] %v4469_v20  ;;  %3459 = vpow2.f32 %v1940_v35  ;;  %v1950_v25 = vmul.f32 1.442695, %v1828_v54  ;;  %v1829_v37 = vsub.f32 %v4686_v36, %v1761_v21  ;;  %2062 = vadd.xlane.f32.xlu0 %v4469_v20  ;;  %v4690_v35 = vld [vmem:[#allocation11_spill] sm:$0xff] }
 0x373   : > { %v4473_v61 = vpop.eup %3447  ;;  %v1755_v13 = vpop.xlane.xlu0 %1754  ;;  %v4696_v20 = vld [vmem:[#allocation15_spill] sm:$0xff] }
 0x374   : > { %4687 = vst [vmem:[#allocation5_spill] sm:$0xff] %v4473_v61  ;;  %3461 = vpow2.f32 %v1950_v25  ;;  %v1952_v19 = vmul.f32 1.442695, %v1829_v37  ;;  %v1826_v28 = vsub.f32 %v4688_v29, %v1755_v13  ;;  %2064 = vadd.xlane.f32.xlu1 %v4473_v61  ;;  %v4693_v29 = vld [vmem:[#allocation12_spill] sm:$0xff] }
 0x375   : > { %v4477_v15 = vpop.eup %3449  ;;  %v1757_v27 = vpop.xlane.xlu1 %1756 }
 0x376   : > { %4689 = vst [vmem:[#allocation6_spill] sm:$0xff] %v4477_v15  ;;  %3463 = vpow2.f32 %v1952_v19  ;;  %v1946_v14 = vmul.f32 1.442695, %v1826_v28  ;;  %v1827_v57 = vsub.f32 %v4690_v35, %v1757_v27  ;;  %2058 = vadd.xlane.f32.xlu0 %v4477_v15  ;;  %v4694_v27 = vld [vmem:[#allocation14_spill] sm:$0xff] }
 0x377   : > { %v4481_v54 = vpop.eup %3451  ;;  %v1767_v21 = vpop.xlane.xlu0 %1766 }
 0x378   : > { %4691 = vst [vmem:[#allocation7_spill] sm:$0xff] %v4481_v54  ;;  %3465 = vpow2.f32 %v1946_v14  ;;  %v1948_v36 = vmul.f32 1.442695, %v1827_v57  ;;  %2060 = vadd.xlane.f32.xlu1 %v4481_v54  ;;  %v1832_v28 = vsub.f32 %v4693_v29, %v1767_v21  ;;  %v4695_v57 = vld [vmem:[#allocation13_spill] sm:$0xff] }
 0x379   : > { %v4484_v25 = vpop.eup %3453  ;;  %v1769_v37 = vpop.xlane.xlu1 %1768 }
 0x37a   : > { %4692 = vst [vmem:[#allocation8_spill] sm:$0xff] %v4484_v25  ;;  %3467 = vpow2.f32 %v1948_v36  ;;  %2070 = vadd.xlane.f32.xlu0 %v4484_v25  ;;  %v1833_v54 = vsub.f32 %v4695_v57, %v1769_v37  ;;  %v1958_v25 = vmul.f32 1.442695, %v1832_v28 }
 0x37b   : > { %v4487_v13 = vpop.eup %3455  ;;  %v1763_v19 = vpop.xlane.xlu0 %1762 }
 0x37c   : > { %v1830_v35 = vsub.f32 %v4694_v27, %v1763_v19  ;;  %2072 = vadd.xlane.f32.xlu1 %v4487_v13  ;;  %v1960_v19 = vmul.f32 1.442695, %v1833_v54 }
 0x37d   : > { %v4492_v15 = vpop.eup %3457  ;;  %v1765_v14 = vpop.xlane.xlu1 %1764 }
 0x37e   : > { %v1954_v61 = vmul.f32 1.442695, %v1830_v35  ;;  %v1831_v31 = vsub.f32 %v4696_v20, %v1765_v14  ;;  %2066 = vadd.xlane.f32.xlu0 %v4492_v15 }
 0x37f   : > { %v4497_v36 = vpop.eup %3459 }
 0x380   : > { %3469 = vpow2.f32 %v1954_v61  ;;  %v1956_v11 = vmul.f32 1.442695, %v1831_v31  ;;  %2068 = vadd.xlane.f32.xlu1 %v4497_v36 }
 0x381   : > { %v4500_v21 = vpop.eup %3461 }
 0x382   : > { %3471 = vpow2.f32 %v1956_v11  ;;  %2078 = vadd.xlane.f32.xlu0 %v4500_v21 }
 0x383   : > { %v4503_v29 = vpop.eup %3463  ;;  %3473 = vpow2.f32 %v1958_v25 }
 0x384   : > { %2080 = vadd.xlane.f32.xlu1 %v4503_v29  ;;  %3475 = vpow2.f32 %v1960_v19 }
 0x385   : > { %v4506_v20 = vpop.eup %3465 }
 0x386   : > { %4697 = vst [vmem:[#allocation9_spill] sm:$0xff] %v4506_v20  ;;  %2074 = vadd.xlane.f32.xlu0 %v4506_v20 }
 0x387   : > { %v4509_v61 = vpop.eup %3467 }
 0x388   : > { %4698 = vst [vmem:[#allocation10_spill] sm:$0xff] %v4509_v61  ;;  %2076 = vadd.xlane.f32.xlu1 %v4509_v61 }
 0x38d   : > { %v4512_v31 = vpop.eup %3469 }
 0x38e   : > { %4699 = vst [vmem:[#allocation11_spill] sm:$0xff] %v4512_v31  ;;  %2082 = vadd.xlane.f32.xlu0 %v4512_v31 }
 0x38f   : > { %v4515_v11 = vpop.eup %3471 }
 0x390   : > { %4700 = vst [vmem:[#allocation12_spill] sm:$0xff] %v4515_v11  ;;  %2084 = vadd.xlane.f32.xlu1 %v4515_v11  ;;  %v4518_v54 = vpop.eup %3473 }
 0x391   : > { %4701 = vst [vmem:[#allocation14_spill] sm:$0xff] %v4518_v54  ;;  %v4521_v25 = vpop.eup %3475 }
 0x392   : > { %2086 = vadd.xlane.f32.xlu0 %v4518_v54  ;;  %4702 = vst [vmem:[#allocation13_spill] sm:$0xff] %v4521_v25 }
 0x394   : > { %2088 = vadd.xlane.f32.xlu1 %v4521_v25 }
 0x399   : > { %v1967_v37 = vpop.xlane.xlu0 %1966 }
 0x39a   : > { %3477 = vrcp.f32 %v1967_v37 }
 0x39d   : > { %v1969_v28 = vpop.xlane.xlu1 %1968  ;;  %v1963_v27 = vpop.xlane.xlu0 %1962 }
 0x39e   : > { %3479 = vrcp.f32 %v1969_v28 }
 0x39f   : > { %3481 = vrcp.f32 %v1963_v27 }
 0x3a1   : > { %v1965_v35 = vpop.xlane.xlu1 %1964 }
 0x3a2   : > { %3483 = vrcp.f32 %v1965_v35 }
 0x3a3   : > { %v1975_v14 = vpop.xlane.xlu0 %1974 }
 0x3a4   : > { %3485 = vrcp.f32 %v1975_v14 }
 0x3a5   : > { %v1977_v57 = vpop.xlane.xlu1 %1976 }
 0x3a6   : > { %3487 = vrcp.f32 %v1977_v57 }
 0x3a7   : > { %v1971_v19 = vpop.xlane.xlu0 %1970  ;;  %v3478_v54 = vpop.eup %3477 }
 0x3a8   : > { %3489 = vrcp.f32 %v1971_v19  ;;  %v2156_v37 = vmul.f32 %v3478_v54, %v4276_v52 }
 0x3a9   : > { %v1973_v11 = vpop.xlane.xlu1 %1972 }
 0x3aa   : > { %3491 = vrcp.f32 %v1973_v11 }
 0x3ab   : > { %v3480_v25 = vpop.eup %3479  ;;  %v1983_v31 = vpop.xlane.xlu0 %1982 }
 0x3ac   : > { %v2157_v61 = vmul.f32 %v3480_v25, %v4283_v43  ;;  %3493 = vrcp.f32 %v1983_v31  ;;  %v3482_v28 = vpop.eup %3481 }
 0x3ad   : > { %v1985_v27 = vpop.xlane.xlu1 %1984  ;;  %v2154_v57 = vmul.f32 %v3482_v28, %v4280_v60 }
 0x3ae   : > { %v2794_v35 = vpack.c.bf16 %v2157_v61, %v2156_v37  ;;  %3495 = vrcp.f32 %v1985_v27 }
 0x3af   : > { %v3484_v14 = vpop.eup %3483  ;;  %v1979_v11 = vpop.xlane.xlu0 %1978 }
 0x3b0   : > { %2946 = vst [vmem:[%s4530_s24 + $0x8] sm:$0xff] %v2794_v35   ;;  %v2155_v52 = vmul.f32 %v3484_v14, %v4289_v6  ;;  %3497 = vrcp.f32 %v1979_v11 }
 0x3b1   : > { %v3486_v43 = vpop.eup %3485  ;;  %v1981_v31 = vpop.xlane.xlu1 %1980 }
 0x3b2   : > { %v2789_v54 = vpack.c.bf16 %v2155_v52, %v2154_v57  ;;  %3499 = vrcp.f32 %v1981_v31  ;;  %v2160_v20 = vmul.f32 %v3486_v43, %v4293_v45 }
 0x3b3   : > { %v3488_v25 = vpop.eup %3487  ;;  %v1991_v19 = vpop.xlane.xlu0 %1990 }
 0x3b4   : > { %2790 = vst [vmem:[%s4530_s24] sm:$0xff] %v2789_v54   ;;  %v2161_v61 = vmul.f32 %v3488_v25, %v4297_v4  ;;  %3501 = vrcp.f32 %v1991_v19 }
 0x3b5   : > { %v3490_v37 = vpop.eup %3489  ;;  %v1993_v27 = vpop.xlane.xlu1 %1992 }
 0x3b6   : > { %v2804_v60 = vpack.c.bf16 %v2161_v61, %v2160_v20  ;;  %3503 = vrcp.f32 %v1993_v27  ;;  %v2158_v35 = vmul.f32 %v3490_v37, %v4301_v42 }
 0x3b7   : > { %v3492_v6 = vpop.eup %3491  ;;  %v1987_v28 = vpop.xlane.xlu0 %1986 }
 0x3b8   : > { %2948 = vst [vmem:[%s4530_s24 + $0x18] sm:$0xff] %v2804_v60   ;;  %v2159_v14 = vmul.f32 %v3492_v6, %v4305_v40  ;;  %3505 = vrcp.f32 %v1987_v28 }
 0x3b9   : > { %v3494_v11 = vpop.eup %3493  ;;  %v1989_v57 = vpop.xlane.xlu1 %1988 }
 0x3ba   : > { %v2799_v45 = vpack.c.bf16 %v2159_v14, %v2158_v35  ;;  %3507 = vrcp.f32 %v1989_v57  ;;  %v2164_v43 = vmul.f32 %v3494_v11, %v4309_v41 }
 0x3bb   : > { %v3496_v4 = vpop.eup %3495  ;;  %v1999_v52 = vpop.xlane.xlu0 %1998 }
 0x3bc   : > { %2947 = vst [vmem:[%s4530_s24 + $0x10] sm:$0xff] %v2799_v45   ;;  %v2165_v20 = vmul.f32 %v3496_v4, %v4313_v46  ;;  %3509 = vrcp.f32 %v1999_v52 }
 0x3bd   : > { %v3498_v31 = vpop.eup %3497  ;;  %v2001_v54 = vpop.xlane.xlu1 %2000 }
 0x3be   : > { %v2814_v42 = vpack.c.bf16 %v2165_v20, %v2164_v43  ;;  %3511 = vrcp.f32 %v2001_v54  ;;  %v2162_v19 = vmul.f32 %v3498_v31, %v4317_v48 }
 0x3bf   : > { %v3500_v40 = vpop.eup %3499  ;;  %v1995_v25 = vpop.xlane.xlu0 %1994 }
 0x3c0   : > { %2950 = vst [vmem:[%s4530_s24 + $0x28] sm:$0xff] %v2814_v42   ;;  %v2163_v61 = vmul.f32 %v3500_v40, %v4321_v49  ;;  %3513 = vrcp.f32 %v1995_v25 }
 0x3c1   : > { %v3502_v37 = vpop.eup %3501  ;;  %v1997_v27 = vpop.xlane.xlu1 %1996 }
 0x3c2   : > { %v2809_v41 = vpack.c.bf16 %v2163_v61, %v2162_v19  ;;  %3515 = vrcp.f32 %v1997_v27  ;;  %v2168_v6 = vmul.f32 %v3502_v37, %v4325_v24 }
 0x3c3   : > { %v3504_v46 = vpop.eup %3503  ;;  %v2007_v60 = vpop.xlane.xlu0 %2006 }
 0x3c4   : > { %2949 = vst [vmem:[%s4530_s24 + $0x20] sm:$0xff] %v2809_v41   ;;  %v2169_v28 = vmul.f32 %v3504_v46, %v4329_v47  ;;  %3517 = vrcp.f32 %v2007_v60 }
 0x3c5   : > { %v3506_v35 = vpop.eup %3505  ;;  %v2009_v14 = vpop.xlane.xlu1 %2008 }
 0x3c6   : > { %v2824_v48 = vpack.c.bf16 %v2169_v28, %v2168_v6  ;;  %3519 = vrcp.f32 %v2009_v14  ;;  %v2166_v57 = vmul.f32 %v3506_v35, %v4333_v53 }
 0x3c7   : > { %v3508_v49 = vpop.eup %3507  ;;  %v2003_v11 = vpop.xlane.xlu0 %2002 }
 0x3c8   : > { %2952 = vst [vmem:[%s4530_s24 + $0x38] sm:$0xff] %v2824_v48   ;;  %v2167_v45 = vmul.f32 %v3508_v49, %v4337_v55  ;;  %3521 = vrcp.f32 %v2003_v11 }
 0x3c9   : > { %v3510_v4 = vpop.eup %3509  ;;  %v2005_v52 = vpop.xlane.xlu1 %2004 }
 0x3ca   : > { %v2819_v24 = vpack.c.bf16 %v2167_v45, %v2166_v57  ;;  %3523 = vrcp.f32 %v2005_v52  ;;  %v2172_v20 = vmul.f32 %v3510_v4, %v4341_v59 }
 0x3cb   : > { %v3512_v47 = vpop.eup %3511  ;;  %v2015_v43 = vpop.xlane.xlu0 %2014 }
 0x3cc   : > { %2951 = vst [vmem:[%s4530_s24 + $0x30] sm:$0xff] %v2819_v24   ;;  %v2173_v31 = vmul.f32 %v3512_v47, %v4345_v62  ;;  %3525 = vrcp.f32 %v2015_v43 }
 0x3cd   : > { %v3514_v54 = vpop.eup %3513  ;;  %v2017_v42 = vpop.xlane.xlu1 %2016 }
 0x3ce   : > { %v2834_v53 = vpack.c.bf16 %v2173_v31, %v2172_v20  ;;  %3527 = vrcp.f32 %v2017_v42  ;;  %v2170_v25 = vmul.f32 %v3514_v54, %v4349_v0 }
 0x3cf   : > { %v3516_v55 = vpop.eup %3515  ;;  %v2011_v40 = vpop.xlane.xlu0 %2010 }
 0x3d0   : > { %2954 = vst [vmem:[%s4530_s24 + $0x48] sm:$0xff] %v2834_v53   ;;  %v2171_v19 = vmul.f32 %v3516_v55, %v4353_v1  ;;  %3529 = vrcp.f32 %v2011_v40 }
 0x3d1   : > { %v3518_v61 = vpop.eup %3517  ;;  %v2013_v37 = vpop.xlane.xlu1 %2012 }
 0x3d2   : > { %v2829_v59 = vpack.c.bf16 %v2171_v19, %v2170_v25  ;;  %3531 = vrcp.f32 %v2013_v37  ;;  %v2176_v41 = vmul.f32 %v3518_v61, %v4357_v58 }
 0x3d3   : > { %v3520_v62 = vpop.eup %3519  ;;  %v2023_v27 = vpop.xlane.xlu0 %2022 }
 0x3d4   : > { %2953 = vst [vmem:[%s4530_s24 + $0x40] sm:$0xff] %v2829_v59   ;;  %v2177_v46 = vmul.f32 %v3520_v62, %v4361_v3  ;;  %3533 = vrcp.f32 %v2023_v27 }
 0x3d5   : > { %v3522_v60 = vpop.eup %3521  ;;  %v2025_v6 = vpop.xlane.xlu1 %2024 }
 0x3d6   : > { %v2844_v0 = vpack.c.bf16 %v2177_v46, %v2176_v41  ;;  %3535 = vrcp.f32 %v2025_v6  ;;  %v2174_v35 = vmul.f32 %v3522_v60, %v4365_v12 }
 0x3d7   : > { %v3524_v1 = vpop.eup %3523  ;;  %v2019_v28 = vpop.xlane.xlu0 %2018 }
 0x3d8   : > { %2956 = vst [vmem:[%s4530_s24 + $0x58] sm:$0xff] %v2844_v0   ;;  %v2175_v14 = vmul.f32 %v3524_v1, %v4369_v8  ;;  %3537 = vrcp.f32 %v2019_v28 }
 0x3d9   : > { %v3526_v48 = vpop.eup %3525  ;;  %v2021_v49 = vpop.xlane.xlu1 %2020 }
 0x3da   : > { %v2839_v58 = vpack.c.bf16 %v2175_v14, %v2174_v35  ;;  %3539 = vrcp.f32 %v2021_v49  ;;  %v2180_v57 = vmul.f32 %v3526_v48, %v4373_v10 }
 0x3db   : > { %v3528_v3 = vpop.eup %3527  ;;  %v2031_v11 = vpop.xlane.xlu0 %2030 }
 0x3dc   : > { %2955 = vst [vmem:[%s4530_s24 + $0x50] sm:$0xff] %v2839_v58   ;;  %v2181_v45 = vmul.f32 %v3528_v3, %v4377_v34  ;;  %3541 = vrcp.f32 %v2031_v11 }
 0x3dd   : > { %v3530_v4 = vpop.eup %3529  ;;  %v2033_v52 = vpop.xlane.xlu1 %2032 }
 0x3de   : > { %v2854_v12 = vpack.c.bf16 %v2181_v45, %v2180_v57  ;;  %3543 = vrcp.f32 %v2033_v52  ;;  %v2178_v47 = vmul.f32 %v3530_v4, %v4381_v18 }
 0x3df   : > { %v3532_v8 = vpop.eup %3531  ;;  %v2027_v24 = vpop.xlane.xlu0 %2026 }
 0x3e0   : > { %2958 = vst [vmem:[%s4530_s24 + $0x68] sm:$0xff] %v2854_v12   ;;  %v2179_v43 = vmul.f32 %v3532_v8, %v4385_v23  ;;  %3545 = vrcp.f32 %v2027_v24 }
 0x3e1   : > { %v3534_v20 = vpop.eup %3533  ;;  %v2029_v31 = vpop.xlane.xlu1 %2028 }
 0x3e2   : > { %v2849_v10 = vpack.c.bf16 %v2179_v43, %v2178_v47  ;;  %3547 = vrcp.f32 %v2029_v31  ;;  %v2184_v42 = vmul.f32 %v3534_v20, %v4389_v32 }
 0x3e3   : > { %v3536_v34 = vpop.eup %3535  ;;  %v2039_v54 = vpop.xlane.xlu0 %2038 }
 0x3e4   : > { %2957 = vst [vmem:[%s4530_s24 + $0x60] sm:$0xff] %v2849_v10   ;;  %v2185_v53 = vmul.f32 %v3536_v34, %v4393_v7  ;;  %3549 = vrcp.f32 %v2039_v54 }
 0x3e5   : > { %v3538_v55 = vpop.eup %3537  ;;  %v2041_v40 = vpop.xlane.xlu1 %2040 }
 0x3e6   : > { %v2864_v18 = vpack.c.bf16 %v2185_v53, %v2184_v42  ;;  %3551 = vrcp.f32 %v2041_v40  ;;  %v2182_v19 = vmul.f32 %v3538_v55, %v4397_v33 }
 0x3e7   : > { %v3540_v23 = vpop.eup %3539  ;;  %v2035_v25 = vpop.xlane.xlu0 %2034 }
 0x3e8   : > { %2960 = vst [vmem:[%s4530_s24 + $0x78] sm:$0xff] %v2864_v18   ;;  %v2183_v61 = vmul.f32 %v3540_v23, %v4401_v39  ;;  %3553 = vrcp.f32 %v2035_v25  ;;  %v4703_v25 = vld [vmem:[#allocation2_spill] sm:$0xff] }
 0x3e9   : > { %v3542_v37 = vpop.eup %3541  ;;  %v2037_v59 = vpop.xlane.xlu1 %2036 }
 0x3ea   : > { %v2859_v32 = vpack.c.bf16 %v2183_v61, %v2182_v19  ;;  %3555 = vrcp.f32 %v2037_v59  ;;  %v2188_v27 = vmul.f32 %v3542_v37, %v4405_v17  ;;  %v4704_v61 = vld [vmem:[#allocation3_spill] sm:$0xff] }
 0x3eb   : > { %v3544_v7 = vpop.eup %3543  ;;  %v2047_v62 = vpop.xlane.xlu0 %2046 }
 0x3ec   : > { %2959 = vst [vmem:[%s4530_s24 + $0x70] sm:$0xff] %v2859_v32   ;;  %v2189_v41 = vmul.f32 %v3544_v7, %v4409_v44  ;;  %3557 = vrcp.f32 %v2047_v62  ;;  %v4705_v62 = vld [vmem:[#allocation4_spill] sm:$0xff] }
 0x3ed   : > { %v3546_v46 = vpop.eup %3545  ;;  %v2049_v60 = vpop.xlane.xlu1 %2048 }
 0x3ee   : > { %v2874_v33 = vpack.c.bf16 %v2189_v41, %v2188_v27  ;;  %3559 = vrcp.f32 %v2049_v60  ;;  %v2186_v0 = vmul.f32 %v3546_v46, %v4413_v50  ;;  %v4706_v41 = vld [vmem:[#allocation5_spill] sm:$0xff] }
 0x3ef   : > { %v3548_v39 = vpop.eup %3547  ;;  %v2043_v6 = vpop.xlane.xlu0 %2042 }
 0x3f0   : > { %2962 = vst [vmem:[%s4530_s24 + $0x88] sm:$0xff] %v2874_v33   ;;  %v2187_v1 = vmul.f32 %v3548_v39, %v4417_v51  ;;  %3561 = vrcp.f32 %v2043_v6 }
 0x3f1   : > { %v3550_v28 = vpop.eup %3549  ;;  %v2045_v35 = vpop.xlane.xlu1 %2044 }
 0x3f2   : > { %v2869_v17 = vpack.c.bf16 %v2187_v1, %v2186_v0  ;;  %3563 = vrcp.f32 %v2045_v35  ;;  %v2192_v48 = vmul.f32 %v3550_v28, %v4421_v56  ;;  %v4707_v1 = vld [vmem:[#allocation6_spill] sm:$0xff]  ;;  %v4708_v35 = vld [vmem:[#allocation7_spill] sm:$0xff] }
 0x3f3   : > { %v3552_v44 = vpop.eup %3551  ;;  %v2055_v14 = vpop.xlane.xlu0 %2054 }
 0x3f4   : > { %2961 = vst [vmem:[%s4530_s24 + $0x80] sm:$0xff] %v2869_v17   ;;  %v2193_v49 = vmul.f32 %v3552_v44, %v4425_v63  ;;  %3565 = vrcp.f32 %v2055_v14 }
 0x3f5   : > { %v3554_v58 = vpop.eup %3553  ;;  %v2057_v3 = vpop.xlane.xlu1 %2056 }
 0x3f6   : > { %v2884_v50 = vpack.c.bf16 %v2193_v49, %v2192_v48  ;;  %3567 = vrcp.f32 %v2057_v3  ;;  %v2190_v57 = vmul.f32 %v3554_v58, %v4429_v2  ;;  %v4709_v58 = vld [vmem:[#allocation8_spill] sm:$0xff] }
 0x3f7   : > { %v3556_v51 = vpop.eup %3555  ;;  %v2051_v11 = vpop.xlane.xlu0 %2050 }
 0x3f8   : > { %2964 = vst [vmem:[%s4530_s24 + $0x98] sm:$0xff] %v2884_v50   ;;  %v2191_v45 = vmul.f32 %v3556_v51, %v4433_v5  ;;  %3569 = vrcp.f32 %v2051_v11 }
 0x3f9   : > { %v3558_v4 = vpop.eup %3557  ;;  %v2053_v52 = vpop.xlane.xlu1 %2052 }
 0x3fa   : > { %v2879_v56 = vpack.c.bf16 %v2191_v45, %v2190_v57  ;;  %3571 = vrcp.f32 %v2053_v52  ;;  %v2196_v8 = vmul.f32 %v3558_v4, %v4437_v9 }
 0x3fb   : > { %v3560_v63 = vpop.eup %3559  ;;  %v2063_v12 = vpop.xlane.xlu0 %2062 }
 0x3fc   : > { %2963 = vst [vmem:[%s4530_s24 + $0x90] sm:$0xff] %v2879_v56   ;;  %v2197_v24 = vmul.f32 %v3560_v63, %v4441_v16  ;;  %3573 = vrcp.f32 %v2063_v12 }
 0x3fd   : > { %v3562_v47 = vpop.eup %3561  ;;  %v2065_v43 = vpop.xlane.xlu1 %2064 }
 0x3fe   : > { %v2894_v2 = vpack.c.bf16 %v2197_v24, %v2196_v8  ;;  %3575 = vrcp.f32 %v2065_v43  ;;  %v2194_v31 = vmul.f32 %v3562_v47, %v4445_v22 }
 0x3ff   : > { %v3564_v5 = vpop.eup %3563  ;;  %v2059_v20 = vpop.xlane.xlu0 %2058 }
 0x400   : > { %2966 = vst [vmem:[%s4530_s24 + $0xa8] sm:$0xff] %v2894_v2   ;;  %v2195_v10 = vmul.f32 %v3564_v5, %v4449_v30  ;;  %3577 = vrcp.f32 %v2059_v20  ;;  %v4710_v5 = vld [vmem:[#allocation9_spill] sm:$0xff] }
 0x401   : > { %v3566_v34 = vpop.eup %3565  ;;  %v2061_v54 = vpop.xlane.xlu1 %2060 }
 0x402   : > { %v2889_v9 = vpack.c.bf16 %v2195_v10, %v2194_v31  ;;  %3579 = vrcp.f32 %v2061_v54  ;;  %v2200_v53 = vmul.f32 %v3566_v34, %v4453_v38  ;;  %v4711_v31 = vld [vmem:[#allocation10_spill] sm:$0xff] }
 0x403   : > { %v3568_v16 = vpop.eup %3567  ;;  %v2071_v42 = vpop.xlane.xlu0 %2070 }
 0x404   : > { %2965 = vst [vmem:[%s4530_s24 + $0xa0] sm:$0xff] %v2889_v9   ;;  %v2201_v55 = vmul.f32 %v3568_v16, %v4457_v26  ;;  %3581 = vrcp.f32 %v2071_v42 }
 0x405   : > { %v3570_v40 = vpop.eup %3569  ;;  %v2073_v18 = vpop.xlane.xlu1 %2072 }
 0x406   : > { %v2904_v22 = vpack.c.bf16 %v2201_v55, %v2200_v53  ;;  %3583 = vrcp.f32 %v2073_v18  ;;  %v2198_v19 = vmul.f32 %v3570_v40, %v4703_v25  ;;  %v4714_v18 = vld [vmem:[#allocation14_spill] sm:$0xff] }
 0x407   : > { %v3572_v30 = vpop.eup %3571  ;;  %v2067_v23 = vpop.xlane.xlu0 %2066 }
 0x408   : > { %2968 = vst [vmem:[%s4530_s24 + $0xb8] sm:$0xff] %v2904_v22   ;;  %v2199_v37 = vmul.f32 %v3572_v30, %v4704_v61  ;;  %3585 = vrcp.f32 %v2067_v23  ;;  %v4715_v30 = vld [vmem:[#allocation13_spill] sm:$0xff] }
 0x409   : > { %v3574_v59 = vpop.eup %3573  ;;  %v2069_v32 = vpop.xlane.xlu1 %2068 }
 0x40a   : > { %v2899_v38 = vpack.c.bf16 %v2199_v37, %v2198_v19  ;;  %3587 = vrcp.f32 %v2069_v32  ;;  %v2204_v27 = vmul.f32 %v3574_v59, %v4705_v62 }
 0x40b   : > { %v3576_v26 = vpop.eup %3575  ;;  %v2079_v7 = vpop.xlane.xlu0 %2078 }
 0x40c   : > { %2967 = vst [vmem:[%s4530_s24 + $0xb0] sm:$0xff] %v2899_v38   ;;  %v2205_v46 = vmul.f32 %v3576_v26, %v4706_v41  ;;  %3589 = vrcp.f32 %v2079_v7 }
 0x40d   : > { %v3578_v60 = vpop.eup %3577  ;;  %v2081_v33 = vpop.xlane.xlu1 %2080 }
 0x40e   : > { %v2914_v39 = vpack.c.bf16 %v2205_v46, %v2204_v27  ;;  %3591 = vrcp.f32 %v2081_v33  ;;  %v2202_v28 = vmul.f32 %v3578_v60, %v4707_v1 }
 0x40f   : > { %v3580_v6 = vpop.eup %3579  ;;  %v2075_v0 = vpop.xlane.xlu0 %2074 }
 0x410   : > { %2970 = vst [vmem:[%s4530_s24 + $0xc8] sm:$0xff] %v2914_v39   ;;  %v2203_v17 = vmul.f32 %v3580_v6, %v4708_v35  ;;  %3593 = vrcp.f32 %v2075_v0 }
 0x411   : > { %v3582_v44 = vpop.eup %3581  ;;  %v2077_v14 = vpop.xlane.xlu1 %2076 }
 0x412   : > { %v2909_v48 = vpack.c.bf16 %v2203_v17, %v2202_v28  ;;  %3595 = vrcp.f32 %v2077_v14  ;;  %v2208_v3 = vmul.f32 %v3582_v44, %v4709_v58 }
 0x413   : > { %v3584_v49 = vpop.eup %3583 }
 0x414   : > { %2969 = vst [vmem:[%s4530_s24 + $0xc0] sm:$0xff] %v2909_v48   ;;  %v2209_v50 = vmul.f32 %v3584_v49, %v4487_v13 }
 0x415   : > { %v3586_v51 = vpop.eup %3585 }
 0x416   : > { %v2924_v11 = vpack.c.bf16 %v2209_v50, %v2208_v3  ;;  %v2206_v4 = vmul.f32 %v3586_v51, %v4492_v15 }
 0x417   : > { %v3588_v57 = vpop.eup %3587  ;;  %v2083_v45 = vpop.xlane.xlu0 %2082 }
 0x418   : > { %2972 = vst [vmem:[%s4530_s24 + $0xd8] sm:$0xff] %v2924_v11   ;;  %v2207_v52 = vmul.f32 %v3588_v57, %v4497_v36  ;;  %3597 = vrcp.f32 %v2083_v45 }
 0x419   : > { %v3590_v56 = vpop.eup %3589  ;;  %v2085_v63 = vpop.xlane.xlu1 %2084 }
 0x41a   : > { %v2919_v12 = vpack.c.bf16 %v2207_v52, %v2206_v4  ;;  %3599 = vrcp.f32 %v2085_v63  ;;  %v2212_v13 = vmul.f32 %v3590_v56, %v4500_v21  ;;  %v4712_v21 = vld [vmem:[#allocation11_spill] sm:$0xff] }
 0x41b   : > { %v3592_v8 = vpop.eup %3591  ;;  %v2087_v24 = vpop.xlane.xlu0 %2086 }
 0x41c   : > { %2971 = vst [vmem:[%s4530_s24 + $0xd0] sm:$0xff] %v2919_v12   ;;  %v2213_v47 = vmul.f32 %v3592_v8, %v4503_v29  ;;  %3601 = vrcp.f32 %v2087_v24  ;;  %v4713_v29 = vld [vmem:[#allocation12_spill] sm:$0xff] }
 0x41d   : > { %v3594_v43 = vpop.eup %3593  ;;  %v2089_v2 = vpop.xlane.xlu1 %2088 }
 0x41e   : > { %v2934_v15 = vpack.c.bf16 %v2213_v47, %v2212_v13  ;;  %3603 = vrcp.f32 %v2089_v2  ;;  %v2210_v20 = vmul.f32 %v3594_v43, %v4710_v5 }
 0x41f   : > { %v3596_v36 = vpop.eup %3595 }
 0x420   : > { %2974 = vst [vmem:[%s4530_s24 + $0xe8] sm:$0xff] %v2934_v15   ;;  %v2211_v10 = vmul.f32 %v3596_v36, %v4711_v31 }
 0x422   : > { %v2929_v34 = vpack.c.bf16 %v2211_v10, %v2210_v20 }
 0x424   : > { %2973 = vst [vmem:[%s4530_s24 + $0xe0] sm:$0xff] %v2929_v34  }
 0x425   : > { %v3598_v54 = vpop.eup %3597 }
 0x426   : > { %v2214_v16 = vmul.f32 %v3598_v54, %v4712_v21 }
 0x427   : > { %v3600_v9 = vpop.eup %3599 }
 0x428   : > { %v2215_v42 = vmul.f32 %v3600_v9, %v4713_v29 }
 0x429   : > { %v3602_v53 = vpop.eup %3601 }
 0x42a   : > { %v2939_v55 = vpack.c.bf16 %v2215_v42, %v2214_v16  ;;  %v2216_v22 = vmul.f32 %v3602_v53, %v4714_v18 }
 0x42b   : > { %v3604_v40 = vpop.eup %3603 }
 0x42c   : > { %2975 = vst [vmem:[%s4530_s24 + $0xf0] sm:$0xff] %v2939_v55   ;;  %v2217_v23 = vmul.f32 %v3604_v40, %v4715_v30 }
 0x42e   : > { %v2944_v25 = vpack.c.bf16 %v2217_v23, %v2216_v22 }
 0x430   : > { %2976 = vst [vmem:[%s4530_s24 + $0xf8] sm:$0xff] %v2944_v25  }
 0x431 PF: > { %s15_s18 = sadd.s32 1, %s3611_s18  }
 0x432   : > { %p12_p4 = scmp.ge.s32.totalorder %s15_s18, 4  }
 0x434   :  { %14 = sbr.rel (!%p12_p4) target bundleno = 1 (0x1), region = 70 }

</bundles_post_ra>
